<compile_context>
chip_gen: v7x
topology: tpu7x:2x2x1
jax: 0.10.0
libtpu: 0.0.40
codegen_flags: <defaults>
</compile_context>

<pallas_src>
import jax
import jax.numpy as jnp
from jax import lax
from jax.experimental import pallas as pl
from jax.experimental.pallas import tpu as pltpu

# ---- problem sizes (small, consistent with the module) ---------------------
SEQ_LEN = 8
BATCH = 8
INPUT_DIM = 16
HIDDEN_DIM = 32
OUTPUT_DIM = 3
NUM_LAYERS = 2  # module hard-codes num_layers = 2

G = 4 * HIDDEN_DIM  # 128 gate lanes — exactly one vreg lane extent

# ---- packed-parameter row layout (all sections 8-row aligned) ---------------
ROW_WIH0 = 0                      # (IN, 4H)   rows   0:16
ROW_WHH0 = 16                     # (H, 4H)    rows  16:48
ROW_WIH1 = 48                     # (H, 4H)    rows  48:80
ROW_WHH1 = 80                     # (H, 4H)    rows  80:112
ROW_B0 = 112                      # (1, 4H)    row  112  (section padded to 8)
ROW_B1 = 120                      # (1, 4H)    row  120
ROW_WL = 128                      # (H, 128)   rows 128:160 (lane-padded linear W^T)
ROW_BL = 160                      # (1, 128)   row  160
N_ROWS = 168                      # 168 x 128 f32 = 84 KiB resident


def lstm_kernel(x_ref, p_ref, out_ref):
    H = HIDDEN_DIM
    B = BATCH
    TB = x_ref.shape[0]
    T = TB // B

    # Resident weights (static, tile-aligned sub-views of the packed buffer).
    wih0 = p_ref[ROW_WIH0:ROW_WIH0 + INPUT_DIM, :]   # (IN, 4H)
    whh0 = p_ref[ROW_WHH0:ROW_WHH0 + H, :]           # (H, 4H)
    wih1 = p_ref[ROW_WIH1:ROW_WIH1 + H, :]           # (H, 4H)
    whh1 = p_ref[ROW_WHH1:ROW_WHH1 + H, :]           # (H, 4H)
    b0 = p_ref[ROW_B0:ROW_B0 + 1, :]                 # (1, 4H)
    b1 = p_ref[ROW_B1:ROW_B1 + 1, :]                 # (1, 4H)
    wl = p_ref[ROW_WL:ROW_WL + H, :]                 # (H, 128) lane-padded
    bl = p_ref[ROW_BL:ROW_BL + 1, :]                 # (1, 128) lane-padded

    # Hoisted layer-0 input projection for all timesteps (no recurrent dep):
    # one (T*B, IN) @ (IN, 4H) MXU op, bias folded in once.
    gx0 = (jnp.dot(x_ref[...], wih0, preferred_element_type=jnp.float32)
           + jnp.broadcast_to(b0, (TB, G)))

    # Layer-1 bias broadcast once (JAX does not CSE broadcast_in_dim).
    b1b = jnp.broadcast_to(b1, (B, G))

    # Per-lane masks for the single-tanh gate nonlinearity, hoisted:
    #   sigmoid lanes (i,f,o): 0.5*tanh(0.5*x) + 0.5
    #   tanh lanes    (g)    : 1.0*tanh(1.0*x) + 0.0
    lane = lax.broadcasted_iota(jnp.int32, (B, G), 1)
    is_g = jnp.logical_and(lane >= 2 * H, lane < 3 * H)
    pre = jnp.where(is_g, 1.0, 0.5).astype(jnp.float32)       # also post-mul
    post_add = jnp.where(is_g, 0.0, 0.5).astype(jnp.float32)

    def apply_gates(gates, c):
        # One full-width EUP tanh pass over the (B, 4H) gate vreg.
        t = jnp.tanh(gates * pre)
        act = t * pre + post_add
        i = act[:, 0 * H:1 * H]
        f = act[:, 1 * H:2 * H]
        g = act[:, 2 * H:3 * H]
        o = act[:, 3 * H:4 * H]
        c_new = f * c + i * g
        h_new = o * jnp.tanh(c_new)
        return h_new, c_new

    z = jnp.zeros((B, H), jnp.float32)
    h0, c0, h1, c1 = z, z, z, z

    # T = 8 static: full unroll so the scheduler sees the whole dependence DAG
    # and can interleave the layer-0 / layer-1 MXU+EUP chains.
    for t in range(T):
        # Layer-1 recurrent term depends only on h1(t-1): independent issue
        # that overlaps the layer-0 chain for this step.
        rec1 = jnp.dot(h1, whh1, preferred_element_type=jnp.float32) + b1b

        # Layer 0: only the recurrent matmul is on the serial path.
        gates0 = gx0[t * B:(t + 1) * B, :] + jnp.dot(
            h0, whh0, preferred_element_type=jnp.float32)
        h0, c0 = apply_gates(gates0, c0)

        # Layer 1: second (un-fused) dot now that h0(t) is available.
        gates1 = rec1 + jnp.dot(h0, wih1, preferred_element_type=jnp.float32)
        h1, c1 = apply_gates(gates1, c1)

    # Final Linear on lstm_out[-1] == h1, lane-dense (B, 128) store.
    out_ref[...] = (jnp.dot(h1, wl, preferred_element_type=jnp.float32)
                    + jnp.broadcast_to(bl, (B, G)))


def lstm_forward(x, params):
    """x: (T, B, input_dim) f32. Returns (B, OUTPUT_DIM) f32."""
    (w_ih0, w_hh0, b_ih0, b_hh0,
     w_ih1, w_hh1, b_ih1, b_hh1,
     w_lin, b_lin) = params

    T, B, IN = x.shape
    H = HIDDEN_DIM

    # Glue: flatten x time-major; pack all parameters into one lane-dense
    # (N_ROWS, 128) buffer with 8-row-aligned sections.
    x2d = x.reshape(T * B, IN).astype(jnp.float32)

    P = jnp.zeros((N_ROWS, G), jnp.float32)
    P = P.at[ROW_WIH0:ROW_WIH0 + IN, :].set(jnp.transpose(w_ih0))   # (IN, 4H)
    P = P.at[ROW_WHH0:ROW_WHH0 + H, :].set(jnp.transpose(w_hh0))    # (H, 4H)
    P = P.at[ROW_WIH1:ROW_WIH1 + H, :].set(jnp.transpose(w_ih1))    # (H, 4H)
    P = P.at[ROW_WHH1:ROW_WHH1 + H, :].set(jnp.transpose(w_hh1))    # (H, 4H)
    P = P.at[ROW_B0, :].set(b_ih0 + b_hh0)                          # fused bias L0
    P = P.at[ROW_B1, :].set(b_ih1 + b_hh1)                          # fused bias L1
    P = P.at[ROW_WL:ROW_WL + H, :OUTPUT_DIM].set(jnp.transpose(w_lin))  # lane-padded
    P = P.at[ROW_BL, :OUTPUT_DIM].set(b_lin)                            # lane-padded

    vmem = pl.BlockSpec(memory_space=pltpu.MemorySpace.VMEM)
    out_padded = pl.pallas_call(
        lstm_kernel,
        out_shape=jax.ShapeDtypeStruct((B, G), jnp.float32),
        in_specs=[vmem, vmem],
        out_specs=vmem,
    )(x2d, P)
    return out_padded[:, :OUTPUT_DIM]


# ---- pure-JAX reference (PyTorch nn.LSTM semantics) for validation ----------
def lstm_reference(x, params):
    (w_ih0, w_hh0, b_ih0, b_hh0,
     w_ih1, w_hh1, b_ih1, b_hh1,
     w_lin, b_lin) = params
    H = HIDDEN_DIM
    B = x.shape[1]

    def cell(x_t, h, c, w_ih, w_hh, b_ih, b_hh):
        g = x_t @ w_ih.T + b_ih + h @ w_hh.T + b_hh
        i = jax.nn.sigmoid(g[:, 0 * H:1 * H])
        f = jax.nn.sigmoid(g[:, 1 * H:2 * H])
        gg = jnp.tanh(g[:, 2 * H:3 * H])
        o = jax.nn.sigmoid(g[:, 3 * H:4 * H])
        c_new = f * c + i * gg
        return o * jnp.tanh(c_new), c_new

    def step(carry, x_t):
        h0, c0, h1, c1 = carry
        h0, c0 = cell(x_t, h0, c0, w_ih0, w_hh0, b_ih0, b_hh0)
        h1, c1 = cell(h0, h1, c1, w_ih1, w_hh1, b_ih1, b_hh1)
        return (h0, c0, h1, c1), None

    z = jnp.zeros((B, H), jnp.float32)
    (h0, c0, h1, c1), _ = lax.scan(step, (z, z, z, z), x)
    return h1 @ w_lin.T + b_lin


def init_params(key):
    """Deterministic init: uniform(-1/sqrt(H), 1/sqrt(H)), like PyTorch's default."""
    k = 1.0 / jnp.sqrt(jnp.float32(HIDDEN_DIM))
    keys = jax.random.split(key, 10)
    u = lambda kk, shape: jax.random.uniform(kk, shape, jnp.float32, -k, k)
    w_ih0 = u(keys[0], (4 * HIDDEN_DIM, INPUT_DIM))
    w_hh0 = u(keys[1], (4 * HIDDEN_DIM, HIDDEN_DIM))
    b_ih0 = u(keys[2], (4 * HIDDEN_DIM,))
    b_hh0 = u(keys[3], (4 * HIDDEN_DIM,))
    w_ih1 = u(keys[4], (4 * HIDDEN_DIM, HIDDEN_DIM))
    w_hh1 = u(keys[5], (4 * HIDDEN_DIM, HIDDEN_DIM))
    b_ih1 = u(keys[6], (4 * HIDDEN_DIM,))
    b_hh1 = u(keys[7], (4 * HIDDEN_DIM,))
    w_lin = u(keys[8], (OUTPUT_DIM, HIDDEN_DIM))
    b_lin = u(keys[9], (OUTPUT_DIM,))
    return (w_ih0, w_hh0, b_ih0, b_hh0,
            w_ih1, w_hh1, b_ih1, b_hh1,
            w_lin, b_lin)


if __name__ == "__main__":
    key = jax.random.PRNGKey(0)
    pkey, xkey = jax.random.split(key)
    params = init_params(pkey)
    x = jax.random.normal(xkey, (SEQ_LEN, BATCH, INPUT_DIM), jnp.float32)

    y = lstm_forward(x, params)
    y = jax.block_until_ready(y)

    y_ref = lstm_reference(x, params)
    assert y.shape == (BATCH, OUTPUT_DIM)
    assert jnp.allclose(y, y_ref, rtol=1e-3, atol=1e-3), "mismatch vs reference"

    print("KERNEL_OK")
</pallas_src>

<mosaic_0001>
module attributes {stable_mosaic.version = 11 : i64} {
  func.func @lstm_kernel(%arg0: memref<64x16xf32, #tpu.memory_space<vmem>>, %arg1: memref<168x128xf32, #tpu.memory_space<vmem>>, %arg2: memref<8x128xf32, #tpu.memory_space<vmem>>) attributes {dimension_semantics = [], scalar_prefetch = 0 : i64, scratch_operands = 0 : i64, tpu.core_type = #tpu.core_type<tc>} {
    %c0 = arith.constant 0 : index
    %c0_0 = arith.constant 0 : index
    %0 = vector.load %arg1[%c0, %c0_0] : memref<168x128xf32, #tpu.memory_space<vmem>>, vector<16x128xf32>
    %c16 = arith.constant 16 : index
    %c0_1 = arith.constant 0 : index
    %1 = vector.load %arg1[%c16, %c0_1] : memref<168x128xf32, #tpu.memory_space<vmem>>, vector<32x128xf32>
    %c48 = arith.constant 48 : index
    %c0_2 = arith.constant 0 : index
    %2 = vector.load %arg1[%c48, %c0_2] : memref<168x128xf32, #tpu.memory_space<vmem>>, vector<32x128xf32>
    %c80 = arith.constant 80 : index
    %c0_3 = arith.constant 0 : index
    %3 = vector.load %arg1[%c80, %c0_3] : memref<168x128xf32, #tpu.memory_space<vmem>>, vector<32x128xf32>
    %c112 = arith.constant 112 : index
    %c0_4 = arith.constant 0 : index
    %4 = vector.load %arg1[%c112, %c0_4] : memref<168x128xf32, #tpu.memory_space<vmem>>, vector<1x128xf32>
    %c120 = arith.constant 120 : index
    %c0_5 = arith.constant 0 : index
    %5 = vector.load %arg1[%c120, %c0_5] : memref<168x128xf32, #tpu.memory_space<vmem>>, vector<1x128xf32>
    %c128 = arith.constant 128 : index
    %c0_6 = arith.constant 0 : index
    %6 = vector.load %arg1[%c128, %c0_6] : memref<168x128xf32, #tpu.memory_space<vmem>>, vector<32x128xf32>
    %c160 = arith.constant 160 : index
    %c0_7 = arith.constant 0 : index
    %7 = vector.load %arg1[%c160, %c0_7] : memref<168x128xf32, #tpu.memory_space<vmem>>, vector<1x128xf32>
    %c0_8 = arith.constant 0 : index
    %c0_9 = arith.constant 0 : index
    %8 = vector.load %arg0[%c0_8, %c0_9] : memref<64x16xf32, #tpu.memory_space<vmem>>, vector<64x16xf32>
    %cst = arith.constant dense<0.000000e+00> : vector<64x128xf32>
    %9 = tpu.matmul %8, %0, %cst {dimension_numbers = #tpu.dot_dimension_numbers<[1], [0], [0], [1], [0, 0, 1, 1], [], []>} : vector<64x16xf32>, vector<16x128xf32>, vector<64x128xf32> -> vector<64x128xf32>
    %10 = vector.shape_cast %4 : vector<1x128xf32> to vector<1x128xf32>
    %11 = vector.broadcast %10 : vector<1x128xf32> to vector<64x128xf32>
    %12 = arith.addf %9, %11 : vector<64x128xf32>
    %13 = vector.shape_cast %5 : vector<1x128xf32> to vector<1x128xf32>
    %14 = vector.broadcast %13 : vector<1x128xf32> to vector<8x128xf32>
    %15 = tpu.iota {dimensions = array<i32: 1>} : vector<8x128xi32>
    %c64_i32 = arith.constant 64 : i32
    %16 = vector.broadcast %c64_i32 : i32 to vector<8x128xi32>
    %17 = arith.cmpi sge, %15, %16 : vector<8x128xi32>
    %c96_i32 = arith.constant 96 : i32
    %18 = vector.broadcast %c96_i32 : i32 to vector<8x128xi32>
    %19 = arith.cmpi slt, %15, %18 : vector<8x128xi32>
    %20 = arith.andi %17, %19 : vector<8x128xi1>
    %cst_10 = arith.constant 1.000000e+00 : f32
    %cst_11 = arith.constant 5.000000e-01 : f32
    %21 = vector.broadcast %cst_10 : f32 to vector<8x128xf32>
    %22 = vector.broadcast %cst_11 : f32 to vector<8x128xf32>
    %23 = arith.select %20, %21, %22 : vector<8x128xi1>, vector<8x128xf32>
    %cst_12 = arith.constant 0.000000e+00 : f32
    %cst_13 = arith.constant 5.000000e-01 : f32
    %24 = vector.broadcast %cst_12 : f32 to vector<8x128xf32>
    %25 = vector.broadcast %cst_13 : f32 to vector<8x128xf32>
    %26 = arith.select %20, %24, %25 : vector<8x128xi1>, vector<8x128xf32>
    %cst_14 = arith.constant 0.000000e+00 : f32
    %27 = vector.broadcast %cst_14 : f32 to vector<8x32xf32>
    %cst_15 = arith.constant dense<0.000000e+00> : vector<8x128xf32>
    %28 = tpu.matmul %27, %3, %cst_15 {dimension_numbers = #tpu.dot_dimension_numbers<[1], [0], [0], [1], [0, 0, 1, 1], [], []>} : vector<8x32xf32>, vector<32x128xf32>, vector<8x128xf32> -> vector<8x128xf32>
    %29 = arith.addf %28, %14 : vector<8x128xf32>
    %30 = vector.extract_strided_slice %12 {offsets = [0, 0], sizes = [8, 128], strides = [1, 1]} : vector<64x128xf32> to vector<8x128xf32>
    %cst_16 = arith.constant dense<0.000000e+00> : vector<8x128xf32>
    %31 = tpu.matmul %27, %1, %cst_16 {dimension_numbers = #tpu.dot_dimension_numbers<[1], [0], [0], [1], [0, 0, 1, 1], [], []>} : vector<8x32xf32>, vector<32x128xf32>, vector<8x128xf32> -> vector<8x128xf32>
    %32 = arith.addf %30, %31 : vector<8x128xf32>
    %33 = arith.mulf %32, %23 : vector<8x128xf32>
    %34 = math.tanh %33 : vector<8x128xf32>
    %35 = arith.mulf %34, %23 : vector<8x128xf32>
    %36 = arith.addf %35, %26 : vector<8x128xf32>
    %37 = vector.extract_strided_slice %36 {offsets = [0, 0], sizes = [8, 32], strides = [1, 1]} : vector<8x128xf32> to vector<8x32xf32>
    %38 = vector.extract_strided_slice %36 {offsets = [0, 32], sizes = [8, 32], strides = [1, 1]} : vector<8x128xf32> to vector<8x32xf32>
    %39 = vector.extract_strided_slice %36 {offsets = [0, 64], sizes = [8, 32], strides = [1, 1]} : vector<8x128xf32> to vector<8x32xf32>
    %40 = vector.extract_strided_slice %36 {offsets = [0, 96], sizes = [8, 32], strides = [1, 1]} : vector<8x128xf32> to vector<8x32xf32>
    %41 = arith.mulf %38, %27 : vector<8x32xf32>
    %42 = arith.mulf %37, %39 : vector<8x32xf32>
    %43 = arith.addf %41, %42 : vector<8x32xf32>
    %44 = math.tanh %43 : vector<8x32xf32>
    %45 = arith.mulf %40, %44 : vector<8x32xf32>
    %cst_17 = arith.constant dense<0.000000e+00> : vector<8x128xf32>
    %46 = tpu.matmul %45, %2, %cst_17 {dimension_numbers = #tpu.dot_dimension_numbers<[1], [0], [0], [1], [0, 0, 1, 1], [], []>} : vector<8x32xf32>, vector<32x128xf32>, vector<8x128xf32> -> vector<8x128xf32>
    %47 = arith.addf %29, %46 : vector<8x128xf32>
    %48 = arith.mulf %47, %23 : vector<8x128xf32>
    %49 = math.tanh %48 : vector<8x128xf32>
    %50 = arith.mulf %49, %23 : vector<8x128xf32>
    %51 = arith.addf %50, %26 : vector<8x128xf32>
    %52 = vector.extract_strided_slice %51 {offsets = [0, 0], sizes = [8, 32], strides = [1, 1]} : vector<8x128xf32> to vector<8x32xf32>
    %53 = vector.extract_strided_slice %51 {offsets = [0, 32], sizes = [8, 32], strides = [1, 1]} : vector<8x128xf32> to vector<8x32xf32>
    %54 = vector.extract_strided_slice %51 {offsets = [0, 64], sizes = [8, 32], strides = [1, 1]} : vector<8x128xf32> to vector<8x32xf32>
    %55 = vector.extract_strided_slice %51 {offsets = [0, 96], sizes = [8, 32], strides = [1, 1]} : vector<8x128xf32> to vector<8x32xf32>
    %56 = arith.mulf %53, %27 : vector<8x32xf32>
    %57 = arith.mulf %52, %54 : vector<8x32xf32>
    %58 = arith.addf %56, %57 : vector<8x32xf32>
    %59 = math.tanh %58 : vector<8x32xf32>
    %60 = arith.mulf %55, %59 : vector<8x32xf32>
    %cst_18 = arith.constant dense<0.000000e+00> : vector<8x128xf32>
    %61 = tpu.matmul %60, %3, %cst_18 {dimension_numbers = #tpu.dot_dimension_numbers<[1], [0], [0], [1], [0, 0, 1, 1], [], []>} : vector<8x32xf32>, vector<32x128xf32>, vector<8x128xf32> -> vector<8x128xf32>
    %62 = arith.addf %61, %14 : vector<8x128xf32>
    %63 = vector.extract_strided_slice %12 {offsets = [8, 0], sizes = [8, 128], strides = [1, 1]} : vector<64x128xf32> to vector<8x128xf32>
    %cst_19 = arith.constant dense<0.000000e+00> : vector<8x128xf32>
    %64 = tpu.matmul %45, %1, %cst_19 {dimension_numbers = #tpu.dot_dimension_numbers<[1], [0], [0], [1], [0, 0, 1, 1], [], []>} : vector<8x32xf32>, vector<32x128xf32>, vector<8x128xf32> -> vector<8x128xf32>
    %65 = arith.addf %63, %64 : vector<8x128xf32>
    %66 = arith.mulf %65, %23 : vector<8x128xf32>
    %67 = math.tanh %66 : vector<8x128xf32>
    %68 = arith.mulf %67, %23 : vector<8x128xf32>
    %69 = arith.addf %68, %26 : vector<8x128xf32>
    %70 = vector.extract_strided_slice %69 {offsets = [0, 0], sizes = [8, 32], strides = [1, 1]} : vector<8x128xf32> to vector<8x32xf32>
    %71 = vector.extract_strided_slice %69 {offsets = [0, 32], sizes = [8, 32], strides = [1, 1]} : vector<8x128xf32> to vector<8x32xf32>
    %72 = vector.extract_strided_slice %69 {offsets = [0, 64], sizes = [8, 32], strides = [1, 1]} : vector<8x128xf32> to vector<8x32xf32>
    %73 = vector.extract_strided_slice %69 {offsets = [0, 96], sizes = [8, 32], strides = [1, 1]} : vector<8x128xf32> to vector<8x32xf32>
    %74 = arith.mulf %71, %43 : vector<8x32xf32>
    %75 = arith.mulf %70, %72 : vector<8x32xf32>
    %76 = arith.addf %74, %75 : vector<8x32xf32>
    %77 = math.tanh %76 : vector<8x32xf32>
    %78 = arith.mulf %73, %77 : vector<8x32xf32>
    %cst_20 = arith.constant dense<0.000000e+00> : vector<8x128xf32>
    %79 = tpu.matmul %78, %2, %cst_20 {dimension_numbers = #tpu.dot_dimension_numbers<[1], [0], [0], [1], [0, 0, 1, 1], [], []>} : vector<8x32xf32>, vector<32x128xf32>, vector<8x128xf32> -> vector<8x128xf32>
    %80 = arith.addf %62, %79 : vector<8x128xf32>
    %81 = arith.mulf %80, %23 : vector<8x128xf32>
    %82 = math.tanh %81 : vector<8x128xf32>
    %83 = arith.mulf %82, %23 : vector<8x128xf32>
    %84 = arith.addf %83, %26 : vector<8x128xf32>
    %85 = vector.extract_strided_slice %84 {offsets = [0, 0], sizes = [8, 32], strides = [1, 1]} : vector<8x128xf32> to vector<8x32xf32>
    %86 = vector.extract_strided_slice %84 {offsets = [0, 32], sizes = [8, 32], strides = [1, 1]} : vector<8x128xf32> to vector<8x32xf32>
    %87 = vector.extract_strided_slice %84 {offsets = [0, 64], sizes = [8, 32], strides = [1, 1]} : vector<8x128xf32> to vector<8x32xf32>
    %88 = vector.extract_strided_slice %84 {offsets = [0, 96], sizes = [8, 32], strides = [1, 1]} : vector<8x128xf32> to vector<8x32xf32>
    %89 = arith.mulf %86, %58 : vector<8x32xf32>
    %90 = arith.mulf %85, %87 : vector<8x32xf32>
    %91 = arith.addf %89, %90 : vector<8x32xf32>
    %92 = math.tanh %91 : vector<8x32xf32>
    %93 = arith.mulf %88, %92 : vector<8x32xf32>
    %cst_21 = arith.constant dense<0.000000e+00> : vector<8x128xf32>
    %94 = tpu.matmul %93, %3, %cst_21 {dimension_numbers = #tpu.dot_dimension_numbers<[1], [0], [0], [1], [0, 0, 1, 1], [], []>} : vector<8x32xf32>, vector<32x128xf32>, vector<8x128xf32> -> vector<8x128xf32>
    %95 = arith.addf %94, %14 : vector<8x128xf32>
    %96 = vector.extract_strided_slice %12 {offsets = [16, 0], sizes = [8, 128], strides = [1, 1]} : vector<64x128xf32> to vector<8x128xf32>
    %cst_22 = arith.constant dense<0.000000e+00> : vector<8x128xf32>
    %97 = tpu.matmul %78, %1, %cst_22 {dimension_numbers = #tpu.dot_dimension_numbers<[1], [0], [0], [1], [0, 0, 1, 1], [], []>} : vector<8x32xf32>, vector<32x128xf32>, vector<8x128xf32> -> vector<8x128xf32>
    %98 = arith.addf %96, %97 : vector<8x128xf32>
    %99 = arith.mulf %98, %23 : vector<8x128xf32>
    %100 = math.tanh %99 : vector<8x128xf32>
    %101 = arith.mulf %100, %23 : vector<8x128xf32>
    %102 = arith.addf %101, %26 : vector<8x128xf32>
    %103 = vector.extract_strided_slice %102 {offsets = [0, 0], sizes = [8, 32], strides = [1, 1]} : vector<8x128xf32> to vector<8x32xf32>
    %104 = vector.extract_strided_slice %102 {offsets = [0, 32], sizes = [8, 32], strides = [1, 1]} : vector<8x128xf32> to vector<8x32xf32>
    %105 = vector.extract_strided_slice %102 {offsets = [0, 64], sizes = [8, 32], strides = [1, 1]} : vector<8x128xf32> to vector<8x32xf32>
    %106 = vector.extract_strided_slice %102 {offsets = [0, 96], sizes = [8, 32], strides = [1, 1]} : vector<8x128xf32> to vector<8x32xf32>
    %107 = arith.mulf %104, %76 : vector<8x32xf32>
    %108 = arith.mulf %103, %105 : vector<8x32xf32>
    %109 = arith.addf %107, %108 : vector<8x32xf32>
    %110 = math.tanh %109 : vector<8x32xf32>
    %111 = arith.mulf %106, %110 : vector<8x32xf32>
    %cst_23 = arith.constant dense<0.000000e+00> : vector<8x128xf32>
    %112 = tpu.matmul %111, %2, %cst_23 {dimension_numbers = #tpu.dot_dimension_numbers<[1], [0], [0], [1], [0, 0, 1, 1], [], []>} : vector<8x32xf32>, vector<32x128xf32>, vector<8x128xf32> -> vector<8x128xf32>
    %113 = arith.addf %95, %112 : vector<8x128xf32>
    %114 = arith.mulf %113, %23 : vector<8x128xf32>
    %115 = math.tanh %114 : vector<8x128xf32>
    %116 = arith.mulf %115, %23 : vector<8x128xf32>
    %117 = arith.addf %116, %26 : vector<8x128xf32>
    %118 = vector.extract_strided_slice %117 {offsets = [0, 0], sizes = [8, 32], strides = [1, 1]} : vector<8x128xf32> to vector<8x32xf32>
    %119 = vector.extract_strided_slice %117 {offsets = [0, 32], sizes = [8, 32], strides = [1, 1]} : vector<8x128xf32> to vector<8x32xf32>
    %120 = vector.extract_strided_slice %117 {offsets = [0, 64], sizes = [8, 32], strides = [1, 1]} : vector<8x128xf32> to vector<8x32xf32>
    %121 = vector.extract_strided_slice %117 {offsets = [0, 96], sizes = [8, 32], strides = [1, 1]} : vector<8x128xf32> to vector<8x32xf32>
    %122 = arith.mulf %119, %91 : vector<8x32xf32>
    %123 = arith.mulf %118, %120 : vector<8x32xf32>
    %124 = arith.addf %122, %123 : vector<8x32xf32>
    %125 = math.tanh %124 : vector<8x32xf32>
    %126 = arith.mulf %121, %125 : vector<8x32xf32>
    %cst_24 = arith.constant dense<0.000000e+00> : vector<8x128xf32>
    %127 = tpu.matmul %126, %3, %cst_24 {dimension_numbers = #tpu.dot_dimension_numbers<[1], [0], [0], [1], [0, 0, 1, 1], [], []>} : vector<8x32xf32>, vector<32x128xf32>, vector<8x128xf32> -> vector<8x128xf32>
    %128 = arith.addf %127, %14 : vector<8x128xf32>
    %129 = vector.extract_strided_slice %12 {offsets = [24, 0], sizes = [8, 128], strides = [1, 1]} : vector<64x128xf32> to vector<8x128xf32>
    %cst_25 = arith.constant dense<0.000000e+00> : vector<8x128xf32>
    %130 = tpu.matmul %111, %1, %cst_25 {dimension_numbers = #tpu.dot_dimension_numbers<[1], [0], [0], [1], [0, 0, 1, 1], [], []>} : vector<8x32xf32>, vector<32x128xf32>, vector<8x128xf32> -> vector<8x128xf32>
    %131 = arith.addf %129, %130 : vector<8x128xf32>
    %132 = arith.mulf %131, %23 : vector<8x128xf32>
    %133 = math.tanh %132 : vector<8x128xf32>
    %134 = arith.mulf %133, %23 : vector<8x128xf32>
    %135 = arith.addf %134, %26 : vector<8x128xf32>
    %136 = vector.extract_strided_slice %135 {offsets = [0, 0], sizes = [8, 32], strides = [1, 1]} : vector<8x128xf32> to vector<8x32xf32>
    %137 = vector.extract_strided_slice %135 {offsets = [0, 32], sizes = [8, 32], strides = [1, 1]} : vector<8x128xf32> to vector<8x32xf32>
    %138 = vector.extract_strided_slice %135 {offsets = [0, 64], sizes = [8, 32], strides = [1, 1]} : vector<8x128xf32> to vector<8x32xf32>
    %139 = vector.extract_strided_slice %135 {offsets = [0, 96], sizes = [8, 32], strides = [1, 1]} : vector<8x128xf32> to vector<8x32xf32>
    %140 = arith.mulf %137, %109 : vector<8x32xf32>
    %141 = arith.mulf %136, %138 : vector<8x32xf32>
    %142 = arith.addf %140, %141 : vector<8x32xf32>
    %143 = math.tanh %142 : vector<8x32xf32>
    %144 = arith.mulf %139, %143 : vector<8x32xf32>
    %cst_26 = arith.constant dense<0.000000e+00> : vector<8x128xf32>
    %145 = tpu.matmul %144, %2, %cst_26 {dimension_numbers = #tpu.dot_dimension_numbers<[1], [0], [0], [1], [0, 0, 1, 1], [], []>} : vector<8x32xf32>, vector<32x128xf32>, vector<8x128xf32> -> vector<8x128xf32>
    %146 = arith.addf %128, %145 : vector<8x128xf32>
    %147 = arith.mulf %146, %23 : vector<8x128xf32>
    %148 = math.tanh %147 : vector<8x128xf32>
    %149 = arith.mulf %148, %23 : vector<8x128xf32>
    %150 = arith.addf %149, %26 : vector<8x128xf32>
    %151 = vector.extract_strided_slice %150 {offsets = [0, 0], sizes = [8, 32], strides = [1, 1]} : vector<8x128xf32> to vector<8x32xf32>
    %152 = vector.extract_strided_slice %150 {offsets = [0, 32], sizes = [8, 32], strides = [1, 1]} : vector<8x128xf32> to vector<8x32xf32>
    %153 = vector.extract_strided_slice %150 {offsets = [0, 64], sizes = [8, 32], strides = [1, 1]} : vector<8x128xf32> to vector<8x32xf32>
    %154 = vector.extract_strided_slice %150 {offsets = [0, 96], sizes = [8, 32], strides = [1, 1]} : vector<8x128xf32> to vector<8x32xf32>
    %155 = arith.mulf %152, %124 : vector<8x32xf32>
    %156 = arith.mulf %151, %153 : vector<8x32xf32>
    %157 = arith.addf %155, %156 : vector<8x32xf32>
    %158 = math.tanh %157 : vector<8x32xf32>
    %159 = arith.mulf %154, %158 : vector<8x32xf32>
    %cst_27 = arith.constant dense<0.000000e+00> : vector<8x128xf32>
    %160 = tpu.matmul %159, %3, %cst_27 {dimension_numbers = #tpu.dot_dimension_numbers<[1], [0], [0], [1], [0, 0, 1, 1], [], []>} : vector<8x32xf32>, vector<32x128xf32>, vector<8x128xf32> -> vector<8x128xf32>
    %161 = arith.addf %160, %14 : vector<8x128xf32>
    %162 = vector.extract_strided_slice %12 {offsets = [32, 0], sizes = [8, 128], strides = [1, 1]} : vector<64x128xf32> to vector<8x128xf32>
    %cst_28 = arith.constant dense<0.000000e+00> : vector<8x128xf32>
    %163 = tpu.matmul %144, %1, %cst_28 {dimension_numbers = #tpu.dot_dimension_numbers<[1], [0], [0], [1], [0, 0, 1, 1], [], []>} : vector<8x32xf32>, vector<32x128xf32>, vector<8x128xf32> -> vector<8x128xf32>
    %164 = arith.addf %162, %163 : vector<8x128xf32>
    %165 = arith.mulf %164, %23 : vector<8x128xf32>
    %166 = math.tanh %165 : vector<8x128xf32>
    %167 = arith.mulf %166, %23 : vector<8x128xf32>
    %168 = arith.addf %167, %26 : vector<8x128xf32>
    %169 = vector.extract_strided_slice %168 {offsets = [0, 0], sizes = [8, 32], strides = [1, 1]} : vector<8x128xf32> to vector<8x32xf32>
    %170 = vector.extract_strided_slice %168 {offsets = [0, 32], sizes = [8, 32], strides = [1, 1]} : vector<8x128xf32> to vector<8x32xf32>
    %171 = vector.extract_strided_slice %168 {offsets = [0, 64], sizes = [8, 32], strides = [1, 1]} : vector<8x128xf32> to vector<8x32xf32>
    %172 = vector.extract_strided_slice %168 {offsets = [0, 96], sizes = [8, 32], strides = [1, 1]} : vector<8x128xf32> to vector<8x32xf32>
    %173 = arith.mulf %170, %142 : vector<8x32xf32>
    %174 = arith.mulf %169, %171 : vector<8x32xf32>
    %175 = arith.addf %173, %174 : vector<8x32xf32>
    %176 = math.tanh %175 : vector<8x32xf32>
    %177 = arith.mulf %172, %176 : vector<8x32xf32>
    %cst_29 = arith.constant dense<0.000000e+00> : vector<8x128xf32>
    %178 = tpu.matmul %177, %2, %cst_29 {dimension_numbers = #tpu.dot_dimension_numbers<[1], [0], [0], [1], [0, 0, 1, 1], [], []>} : vector<8x32xf32>, vector<32x128xf32>, vector<8x128xf32> -> vector<8x128xf32>
    %179 = arith.addf %161, %178 : vector<8x128xf32>
    %180 = arith.mulf %179, %23 : vector<8x128xf32>
    %181 = math.tanh %180 : vector<8x128xf32>
    %182 = arith.mulf %181, %23 : vector<8x128xf32>
    %183 = arith.addf %182, %26 : vector<8x128xf32>
    %184 = vector.extract_strided_slice %183 {offsets = [0, 0], sizes = [8, 32], strides = [1, 1]} : vector<8x128xf32> to vector<8x32xf32>
    %185 = vector.extract_strided_slice %183 {offsets = [0, 32], sizes = [8, 32], strides = [1, 1]} : vector<8x128xf32> to vector<8x32xf32>
    %186 = vector.extract_strided_slice %183 {offsets = [0, 64], sizes = [8, 32], strides = [1, 1]} : vector<8x128xf32> to vector<8x32xf32>
    %187 = vector.extract_strided_slice %183 {offsets = [0, 96], sizes = [8, 32], strides = [1, 1]} : vector<8x128xf32> to vector<8x32xf32>
    %188 = arith.mulf %185, %157 : vector<8x32xf32>
    %189 = arith.mulf %184, %186 : vector<8x32xf32>
    %190 = arith.addf %188, %189 : vector<8x32xf32>
    %191 = math.tanh %190 : vector<8x32xf32>
    %192 = arith.mulf %187, %191 : vector<8x32xf32>
    %cst_30 = arith.constant dense<0.000000e+00> : vector<8x128xf32>
    %193 = tpu.matmul %192, %3, %cst_30 {dimension_numbers = #tpu.dot_dimension_numbers<[1], [0], [0], [1], [0, 0, 1, 1], [], []>} : vector<8x32xf32>, vector<32x128xf32>, vector<8x128xf32> -> vector<8x128xf32>
    %194 = arith.addf %193, %14 : vector<8x128xf32>
    %195 = vector.extract_strided_slice %12 {offsets = [40, 0], sizes = [8, 128], strides = [1, 1]} : vector<64x128xf32> to vector<8x128xf32>
    %cst_31 = arith.constant dense<0.000000e+00> : vector<8x128xf32>
    %196 = tpu.matmul %177, %1, %cst_31 {dimension_numbers = #tpu.dot_dimension_numbers<[1], [0], [0], [1], [0, 0, 1, 1], [], []>} : vector<8x32xf32>, vector<32x128xf32>, vector<8x128xf32> -> vector<8x128xf32>
    %197 = arith.addf %195, %196 : vector<8x128xf32>
    %198 = arith.mulf %197, %23 : vector<8x128xf32>
    %199 = math.tanh %198 : vector<8x128xf32>
    %200 = arith.mulf %199, %23 : vector<8x128xf32>
    %201 = arith.addf %200, %26 : vector<8x128xf32>
    %202 = vector.extract_strided_slice %201 {offsets = [0, 0], sizes = [8, 32], strides = [1, 1]} : vector<8x128xf32> to vector<8x32xf32>
    %203 = vector.extract_strided_slice %201 {offsets = [0, 32], sizes = [8, 32], strides = [1, 1]} : vector<8x128xf32> to vector<8x32xf32>
    %204 = vector.extract_strided_slice %201 {offsets = [0, 64], sizes = [8, 32], strides = [1, 1]} : vector<8x128xf32> to vector<8x32xf32>
    %205 = vector.extract_strided_slice %201 {offsets = [0, 96], sizes = [8, 32], strides = [1, 1]} : vector<8x128xf32> to vector<8x32xf32>
    %206 = arith.mulf %203, %175 : vector<8x32xf32>
    %207 = arith.mulf %202, %204 : vector<8x32xf32>
    %208 = arith.addf %206, %207 : vector<8x32xf32>
    %209 = math.tanh %208 : vector<8x32xf32>
    %210 = arith.mulf %205, %209 : vector<8x32xf32>
    %cst_32 = arith.constant dense<0.000000e+00> : vector<8x128xf32>
    %211 = tpu.matmul %210, %2, %cst_32 {dimension_numbers = #tpu.dot_dimension_numbers<[1], [0], [0], [1], [0, 0, 1, 1], [], []>} : vector<8x32xf32>, vector<32x128xf32>, vector<8x128xf32> -> vector<8x128xf32>
    %212 = arith.addf %194, %211 : vector<8x128xf32>
    %213 = arith.mulf %212, %23 : vector<8x128xf32>
    %214 = math.tanh %213 : vector<8x128xf32>
    %215 = arith.mulf %214, %23 : vector<8x128xf32>
    %216 = arith.addf %215, %26 : vector<8x128xf32>
    %217 = vector.extract_strided_slice %216 {offsets = [0, 0], sizes = [8, 32], strides = [1, 1]} : vector<8x128xf32> to vector<8x32xf32>
    %218 = vector.extract_strided_slice %216 {offsets = [0, 32], sizes = [8, 32], strides = [1, 1]} : vector<8x128xf32> to vector<8x32xf32>
    %219 = vector.extract_strided_slice %216 {offsets = [0, 64], sizes = [8, 32], strides = [1, 1]} : vector<8x128xf32> to vector<8x32xf32>
    %220 = vector.extract_strided_slice %216 {offsets = [0, 96], sizes = [8, 32], strides = [1, 1]} : vector<8x128xf32> to vector<8x32xf32>
    %221 = arith.mulf %218, %190 : vector<8x32xf32>
    %222 = arith.mulf %217, %219 : vector<8x32xf32>
    %223 = arith.addf %221, %222 : vector<8x32xf32>
    %224 = math.tanh %223 : vector<8x32xf32>
    %225 = arith.mulf %220, %224 : vector<8x32xf32>
    %cst_33 = arith.constant dense<0.000000e+00> : vector<8x128xf32>
    %226 = tpu.matmul %225, %3, %cst_33 {dimension_numbers = #tpu.dot_dimension_numbers<[1], [0], [0], [1], [0, 0, 1, 1], [], []>} : vector<8x32xf32>, vector<32x128xf32>, vector<8x128xf32> -> vector<8x128xf32>
    %227 = arith.addf %226, %14 : vector<8x128xf32>
    %228 = vector.extract_strided_slice %12 {offsets = [48, 0], sizes = [8, 128], strides = [1, 1]} : vector<64x128xf32> to vector<8x128xf32>
    %cst_34 = arith.constant dense<0.000000e+00> : vector<8x128xf32>
    %229 = tpu.matmul %210, %1, %cst_34 {dimension_numbers = #tpu.dot_dimension_numbers<[1], [0], [0], [1], [0, 0, 1, 1], [], []>} : vector<8x32xf32>, vector<32x128xf32>, vector<8x128xf32> -> vector<8x128xf32>
    %230 = arith.addf %228, %229 : vector<8x128xf32>
    %231 = arith.mulf %230, %23 : vector<8x128xf32>
    %232 = math.tanh %231 : vector<8x128xf32>
    %233 = arith.mulf %232, %23 : vector<8x128xf32>
    %234 = arith.addf %233, %26 : vector<8x128xf32>
    %235 = vector.extract_strided_slice %234 {offsets = [0, 0], sizes = [8, 32], strides = [1, 1]} : vector<8x128xf32> to vector<8x32xf32>
    %236 = vector.extract_strided_slice %234 {offsets = [0, 32], sizes = [8, 32], strides = [1, 1]} : vector<8x128xf32> to vector<8x32xf32>
    %237 = vector.extract_strided_slice %234 {offsets = [0, 64], sizes = [8, 32], strides = [1, 1]} : vector<8x128xf32> to vector<8x32xf32>
    %238 = vector.extract_strided_slice %234 {offsets = [0, 96], sizes = [8, 32], strides = [1, 1]} : vector<8x128xf32> to vector<8x32xf32>
    %239 = arith.mulf %236, %208 : vector<8x32xf32>
    %240 = arith.mulf %235, %237 : vector<8x32xf32>
    %241 = arith.addf %239, %240 : vector<8x32xf32>
    %242 = math.tanh %241 : vector<8x32xf32>
    %243 = arith.mulf %238, %242 : vector<8x32xf32>
    %cst_35 = arith.constant dense<0.000000e+00> : vector<8x128xf32>
    %244 = tpu.matmul %243, %2, %cst_35 {dimension_numbers = #tpu.dot_dimension_numbers<[1], [0], [0], [1], [0, 0, 1, 1], [], []>} : vector<8x32xf32>, vector<32x128xf32>, vector<8x128xf32> -> vector<8x128xf32>
    %245 = arith.addf %227, %244 : vector<8x128xf32>
    %246 = arith.mulf %245, %23 : vector<8x128xf32>
    %247 = math.tanh %246 : vector<8x128xf32>
    %248 = arith.mulf %247, %23 : vector<8x128xf32>
    %249 = arith.addf %248, %26 : vector<8x128xf32>
    %250 = vector.extract_strided_slice %249 {offsets = [0, 0], sizes = [8, 32], strides = [1, 1]} : vector<8x128xf32> to vector<8x32xf32>
    %251 = vector.extract_strided_slice %249 {offsets = [0, 32], sizes = [8, 32], strides = [1, 1]} : vector<8x128xf32> to vector<8x32xf32>
    %252 = vector.extract_strided_slice %249 {offsets = [0, 64], sizes = [8, 32], strides = [1, 1]} : vector<8x128xf32> to vector<8x32xf32>
    %253 = vector.extract_strided_slice %249 {offsets = [0, 96], sizes = [8, 32], strides = [1, 1]} : vector<8x128xf32> to vector<8x32xf32>
    %254 = arith.mulf %251, %223 : vector<8x32xf32>
    %255 = arith.mulf %250, %252 : vector<8x32xf32>
    %256 = arith.addf %254, %255 : vector<8x32xf32>
    %257 = math.tanh %256 : vector<8x32xf32>
    %258 = arith.mulf %253, %257 : vector<8x32xf32>
    %cst_36 = arith.constant dense<0.000000e+00> : vector<8x128xf32>
    %259 = tpu.matmul %258, %3, %cst_36 {dimension_numbers = #tpu.dot_dimension_numbers<[1], [0], [0], [1], [0, 0, 1, 1], [], []>} : vector<8x32xf32>, vector<32x128xf32>, vector<8x128xf32> -> vector<8x128xf32>
    %260 = arith.addf %259, %14 : vector<8x128xf32>
    %261 = vector.extract_strided_slice %12 {offsets = [56, 0], sizes = [8, 128], strides = [1, 1]} : vector<64x128xf32> to vector<8x128xf32>
    %cst_37 = arith.constant dense<0.000000e+00> : vector<8x128xf32>
    %262 = tpu.matmul %243, %1, %cst_37 {dimension_numbers = #tpu.dot_dimension_numbers<[1], [0], [0], [1], [0, 0, 1, 1], [], []>} : vector<8x32xf32>, vector<32x128xf32>, vector<8x128xf32> -> vector<8x128xf32>
    %263 = arith.addf %261, %262 : vector<8x128xf32>
    %264 = arith.mulf %263, %23 : vector<8x128xf32>
    %265 = math.tanh %264 : vector<8x128xf32>
    %266 = arith.mulf %265, %23 : vector<8x128xf32>
    %267 = arith.addf %266, %26 : vector<8x128xf32>
    %268 = vector.extract_strided_slice %267 {offsets = [0, 0], sizes = [8, 32], strides = [1, 1]} : vector<8x128xf32> to vector<8x32xf32>
    %269 = vector.extract_strided_slice %267 {offsets = [0, 32], sizes = [8, 32], strides = [1, 1]} : vector<8x128xf32> to vector<8x32xf32>
    %270 = vector.extract_strided_slice %267 {offsets = [0, 64], sizes = [8, 32], strides = [1, 1]} : vector<8x128xf32> to vector<8x32xf32>
    %271 = vector.extract_strided_slice %267 {offsets = [0, 96], sizes = [8, 32], strides = [1, 1]} : vector<8x128xf32> to vector<8x32xf32>
    %272 = arith.mulf %269, %241 : vector<8x32xf32>
    %273 = arith.mulf %268, %270 : vector<8x32xf32>
    %274 = arith.addf %272, %273 : vector<8x32xf32>
    %275 = math.tanh %274 : vector<8x32xf32>
    %276 = arith.mulf %271, %275 : vector<8x32xf32>
    %cst_38 = arith.constant dense<0.000000e+00> : vector<8x128xf32>
    %277 = tpu.matmul %276, %2, %cst_38 {dimension_numbers = #tpu.dot_dimension_numbers<[1], [0], [0], [1], [0, 0, 1, 1], [], []>} : vector<8x32xf32>, vector<32x128xf32>, vector<8x128xf32> -> vector<8x128xf32>
    %278 = arith.addf %260, %277 : vector<8x128xf32>
    %279 = arith.mulf %278, %23 : vector<8x128xf32>
    %280 = math.tanh %279 : vector<8x128xf32>
    %281 = arith.mulf %280, %23 : vector<8x128xf32>
    %282 = arith.addf %281, %26 : vector<8x128xf32>
    %283 = vector.extract_strided_slice %282 {offsets = [0, 0], sizes = [8, 32], strides = [1, 1]} : vector<8x128xf32> to vector<8x32xf32>
    %284 = vector.extract_strided_slice %282 {offsets = [0, 32], sizes = [8, 32], strides = [1, 1]} : vector<8x128xf32> to vector<8x32xf32>
    %285 = vector.extract_strided_slice %282 {offsets = [0, 64], sizes = [8, 32], strides = [1, 1]} : vector<8x128xf32> to vector<8x32xf32>
    %286 = vector.extract_strided_slice %282 {offsets = [0, 96], sizes = [8, 32], strides = [1, 1]} : vector<8x128xf32> to vector<8x32xf32>
    %287 = arith.mulf %284, %256 : vector<8x32xf32>
    %288 = arith.mulf %283, %285 : vector<8x32xf32>
    %289 = arith.addf %287, %288 : vector<8x32xf32>
    %290 = math.tanh %289 : vector<8x32xf32>
    %291 = arith.mulf %286, %290 : vector<8x32xf32>
    %cst_39 = arith.constant dense<0.000000e+00> : vector<8x128xf32>
    %292 = tpu.matmul %291, %6, %cst_39 {dimension_numbers = #tpu.dot_dimension_numbers<[1], [0], [0], [1], [0, 0, 1, 1], [], []>} : vector<8x32xf32>, vector<32x128xf32>, vector<8x128xf32> -> vector<8x128xf32>
    %293 = vector.shape_cast %7 : vector<1x128xf32> to vector<1x128xf32>
    %294 = vector.broadcast %293 : vector<1x128xf32> to vector<8x128xf32>
    %295 = arith.addf %292, %294 : vector<8x128xf32>
    %c0_40 = arith.constant 0 : index
    %c0_41 = arith.constant 0 : index
    %296 = vector.load %arg2[%c0_40, %c0_41] : memref<8x128xf32, #tpu.memory_space<vmem>>, vector<8x128xf32>
    tpu.vector_store %arg2[%c0_40, %c0_41], %295 {strides = array<i32>} : memref<8x128xf32, #tpu.memory_space<vmem>>, vector<8x128xf32>,
    return
  }
}

</mosaic_0001>

<bundles_post_ra>
// kernel: tpu_custom_call.1
= control target key start
LH: loop header
LB: loop body
LE: loop exit
PB: predicated region body
PF: predicated region fallthrough
CT: control target
= control target key end

     0   :  { %7 = vsyncpa [#allocation3], 0  ;;  %s3597_s0 = inlined_call_operand.vmem [shape: f32[64,16], index: 0, kind: input, shape index: {}]   ;;  %s3598_s1 = inlined_call_operand.hbm [shape: f32[168,128], index: 1, kind: input, shape index: {}]   ;;  %s3599_s2 = inlined_call_operand.hbm [shape: f32[8,128], index: 2, kind: output, shape index: {}]  }
   0x1   :  { %8 = vsyncpa [#allocation4], 0  ;;  %s3166_s9 = smov [#allocation2]   ;;  %s3118_s13 = scalar_lea.hbm %s3598_s1, 2688 }
   0x2   :  { %s16_s10 = sshll.u32 %s3166_s9, 4  ;;  %p3119_p0 = scmp.ne.s32.totalorder %s3598_s1, %s3118_s13  ;;  %s17_s10 = int_to_ptr.vmem [resolvable:$true] %s16_s10 }
   0x3   :  { %p3122_p1 = scmp.lt.u32.totalorder %s3118_s13, %s3598_s1 }
   0x5   :  { %p3124_p2 = pnand %p3122_p1, %p3119_p0 }
   0x7   :  { %3127 = shalt.err (!%p3124_p2)
}
   0x8   :  { %s3128_s18 = scalar_lea.vmem %s17_s10, 2688  ;;  %p3133_p4 = scmp.lt.s32.totalorder %s17_s10, %s17_s10 }
   0x9   :  { %p3129_p3 = scmp.ne.s32.totalorder %s17_s10, %s3128_s18  ;;  %p3134_p5 = scmp.lt.s32.totalorder %s3128_s18, %s3128_s18 }
   0xb   :  { %p3135_p6 = por %p3134_p5, %p3133_p4 }
   0xd   :  { %p3136_p7 = pnand %p3135_p6, %p3129_p3 }
   0xf   :  { %3139 = shalt.err (!%p3136_p7)
}
  0x10   :  { %s3167_s19 = smov 128   ;;  %s3168_s20 = smov 8  }
  0x11   :  { %22 = dma.hbm_to_vmem [thread:$0]  %s3598_s1, 2688, %s17_s10, [#allocation3], %s3167_s19, %s3167_s19, %s3168_s20  }
  0x12   :  { %3162 = dma.done.wait [#allocation3], 2688  }
  0x13   :  { %3163 = vsyncadd [#allocation3], 4294964608  ;;  %v3169_v0 = vmov 0.0|0.0   ;;  %vm3170_vm0 = vmmov 0   ;;  %v3171_v1 = vmov 0.0   ;;  %v36_v2 = vld [vmem:[#allocation2 + $0x50] sm:$0xff]  ;;  %v193_v19 = vlaneseq }
  0x14   :  { %2870 = vmatprep.subr.bf16.mxu1 %v3169_v0  ;;  %2599 = vmatprep.mubr.msk.f32.mxu1 %vm3170_vm0, %v3171_v1  ;;  %v37_v3 = vld [vmem:[#allocation2 + $0x58] sm:$0xff]  ;;  %v38_v4 = vld [vmem:[#allocation2 + $0x60] sm:$0xff]  ;;  %vm59_vm1 = vcmask 130048   ;;  %v39_v6 = vld [vmem:[#allocation2 + $0x68] sm:$0xff]  ;;  %v3172_v25 = vmov 0.5   ;;  %s3173_s26 = smov 64  }
  0x15   :  { %v3206_v5 = vpack.c.bf16 %v37_v3, %v36_v2  ;;  %v26_v7 = vld [vmem:[#allocation2] sm:$0xff]  ;;  %v27_v8 = vld [vmem:[#allocation2 + $0x8] sm:$0xff]  ;;  %v3212_v11 = vpack.c.bf16 %v39_v6, %v38_v4  ;;  %v28_v12 = vld [vmem:[#allocation2 + $0x10] sm:$0xff]  ;;  %v194_v21 = vand.u32 127, %v193_v19  ;;  %s3174_s27 = smov 32   ;;  %vm200_vm5 = vcmask 261120  }
  0x16   :  { %v2866_v9 = vpack.c.bf16 %v27_v8, %v26_v7  ;;  %v47_v10 = vld [vmem:[%s3597_s0] sm:$0xff]  ;;  %v29_v13 = vld [vmem:[#allocation2 + $0x18] sm:$0xff]  ;;  %v48_v14 = vld [vmem:[%s3597_s0 + $0x8] sm:$0xff] }
  0x17   :  { %2872 = vmatpush3.bf16.msra.mxu1 %v3206_v5  ;;  %2579 = vmatprep.mubr.msk.f32.mxu0 %vm59_vm1, %v47_v10  ;;  %v3221_v15 = vpack.c.bf16 %v29_v13, %v28_v12  ;;  %v30_v16 = vld [vmem:[#allocation2 + $0x20] sm:$0xff]  ;;  %v31_v17 = vld [vmem:[#allocation2 + $0x28] sm:$0xff]  ;;  %v3243_v23 = vld [vmem:[#allocation2 + $0x70] ss:$0 sm:$0xff]  ;;  %vm195_vm2 = vcmp.ge.s32.totalorder %v194_v21, 64  ;;  %vm196_vm3 = vcmp.lt.s32.totalorder %v194_v21, 96 }
  0x18   :  { %2873 = vmatprep.subr.bf16.mxu1 %v3169_v0  ;;  %2867 = vmatprep.subr.bf16.mxu0 %v2866_v9  ;;  %v3229_v18 = vpack.c.bf16 %v31_v17, %v30_v16  ;;  %vm197_vm4 = vmand %vm195_vm2, %vm196_vm3  ;;  %v32_v40 = vld [vmem:[#allocation2 + $0x30] sm:$0xff]  ;;  %v33_v41 = vld [vmem:[#allocation2 + $0x38] sm:$0xff] }
  0x19   :  { %2869 = vmatpush3.bf16.msra.mxu0 %v2866_v9  ;;  %v3246_v26 = vsel %vm197_vm4, 1.0, %v3172_v25  ;;  %v3249_v32 = vsel %vm197_vm4, 0.0, %v3172_v25  ;;  %v34_v42 = vld [vmem:[#allocation2 + $0x40] sm:$0xff]  ;;  %v3258_v43 = vpack.c.bf16 %v33_v41, %v32_v40  ;;  %v35_v44 = vld [vmem:[#allocation2 + $0x48] sm:$0xff]  ;;  %v3275_v50 = vld [vmem:[#allocation2 + $0x78] ss:$0 sm:$0xff] }
  0x1a   :  { %2888 = vmatprep.subr.bf16.mxu0 %v3169_v0  ;;  %v3261_v45 = vpack.c.bf16 %v35_v44, %v34_v42  ;;  %v49_v63 = vld [vmem:[%s3597_s0 + $0x10] sm:$0xff]  ;;  %v50_v2 = vld [vmem:[%s3597_s0 + $0x18] sm:$0xff]  ;;  %v51_v3 = vld [vmem:[%s3597_s0 + $0x20] sm:$0xff] }
  0x1b   :  { %2875 = vmatpush3.bf16.msra.mxu1 %v3212_v11  ;;  %v52_v4 = vld [vmem:[%s3597_s0 + $0x28] sm:$0xff]  ;;  %v53_v6 = vld [vmem:[%s3597_s0 + $0x30] sm:$0xff]  ;;  %v54_v7 = vld [vmem:[%s3597_s0 + $0x38] sm:$0xff]  ;;  %s3175_s0 = smov [#allocation5]  }
  0x1c   :  { %2876 = vmatprep.subr.bf16.mxu1 %v3169_v0  ;;  %2580 = vmatmul.mubr.msk.f32.vlgmr.msra.gmra.mrb[0].mxu0 %vm59_vm1, %v48_v14  ;;  %s2397_s12 = sshll.u32 %s3175_s0, 4  ;;  %s2398_s12 = int_to_ptr.vmem [resolvable:$true] %s2397_s12 }
  0x1d   :  { %2890 = vmatpush3.bf16.msra.mxu0 %v3206_v5  ;;  %2582 = vmatprep.mubr.msk.f32.mxu0 %vm59_vm1, %v49_v63  ;;  %s3140_s13 = scalar_lea.vmem %s2398_s12, 128  ;;  %p3145_p9 = scmp.lt.s32.totalorder %s2398_s12, %s2398_s12 }
  0x1e   :  { %2600 = vmatmul.mubr.f32.vlgmr.msra.gmra.mrb[0].mxu1 %v3171_v1  ;;  %2891 = vmatprep.subr.bf16.mxu0 %v3169_v0  ;;  %p3141_p8 = scmp.ne.s32.totalorder %s2398_s12, %s3140_s13  ;;  %p3146_p10 = scmp.lt.s32.totalorder %s3140_s13, %s3140_s13 }
  0x1f   :  { %2878 = vmatpush3.bf16.msra.mxu1 %v3221_v15  ;;  %2610 = vmatprep.mubr.msk.f32.mxu1 %vm3170_vm0, %v3171_v1 }
  0x20   :  { %2879 = vmatprep.subr.bf16.mxu1 %v3169_v0  ;;  %2583 = vmatmul.mubr.msk.f32.gmra.mrb[2].mxu0 %vm59_vm1, %v50_v2  ;;  %p3147_p11 = por %p3146_p10, %p3145_p9 }
  0x21   :  { %2893 = vmatpush3.bf16.msra.mxu0 %v3212_v11  ;;  %2585 = vmatprep.mubr.msk.f32.mxu0 %vm59_vm1, %v51_v3 }
  0x22   :  { %2894 = vmatprep.subr.bf16.mxu0 %v3169_v0  ;;  %p3148_p12 = pnand %p3147_p11, %p3141_p8 }
  0x23   :  { %2881 = vmatpush3.bf16.msra.mxu1 %v3229_v18 }
  0x24   :  { %2882 = vmatprep.subr.bf16.mxu1 %v3169_v0  ;;  %2586 = vmatmul.mubr.msk.f32.gmra.mrb[4].mxu0 %vm59_vm1, %v52_v4 }
  0x25   :  { %2588 = vmatprep.mubr.msk.f32.mxu0 %vm59_vm1, %v53_v6 }
  0x26   :  { %2611 = vmatmul.mubr.f32.vlgmr.msra.gmra.mrb[2].mxu1 %v3171_v1 }
  0x27   :  { %2621 = vmatprep.mubr.msk.f32.mxu1 %vm3170_vm0, %v3171_v1  ;;  %2884 = vmatpush3.bf16.msra.mxu1 %v3258_v43 }
  0x28   :  { %2885 = vmatprep.subr.bf16.mxu1 %v3169_v0  ;;  %2589 = vmatmul.mubr.msk.f32.gmra.mrb[6].mxu0 %vm59_vm1, %v54_v7 }
  0x29   :  { %2632 = vmatprep.mubr.msk.f32.mxu0 %vm3170_vm0, %v3171_v1 }
  0x2b   :  { %2887 = vmatpush3.bf16.msra.mxu1 %v3261_v45 }
  0x2c   :  { %2906 = vmatprep.subr.bf16.mxu1 %v3169_v0 }
  0xef   :  { %v3241_v20 = vpop.f32.mrb[0].mxu0 }
  0xf0   :  { %v150_v22 = vpop.f32.mrb[1].mxu0 }
  0xf1   :  { %v151_v24 = vadd.f32 %v3243_v23, %v150_v22  ;;  %v156_v22 = vadd.f32 %v3241_v20, %v3243_v23 }
  0xf3   :  { %v3314_v12 = vpop.f32.mrb[2].mxu0 }
  0xf4   :  { %v3316_v13 = vpop.f32.mrb[3].mxu0 }
  0xf7   :  { %v3318_v14 = vpop.f32.mrb[4].mxu0 }
  0xf8   :  { %v3320_v16 = vpop.f32.mrb[5].mxu0 }
  0xf9   :  { %v340_v27 = vpop.f32.mrb[2].mxu1 }
  0xfa   :  { %v344_v28 = vadd.f32 %v340_v27, %v151_v24  ;;  %v2612_v29 = vpop.f32.mrb[3].mxu1 }
  0xfb   :  { %v3322_v17 = vpop.f32.mrb[6].mxu0 }
  0xfc   :  { %v345_v30 = vmul.f32 %v344_v28, %v3246_v26  ;;  %v3324_v19 = vpop.f32.mrb[7].mxu0 }
  0xfe   :  { %3054 = vtanh.f32 %v345_v30 }
 0x108   :  { %v3055_v31 = vpop.eup %3054 }
 0x109   :  { %v347_v33 = vmul.f32 %v3055_v31, %v3246_v26 }
 0x10b   :  { %v348_v34 = vadd.f32 %v347_v33, %v3249_v32 }
 0x10d   :  { %351 = vrot.lane.b32.xlu0 %v348_v34, %s3173_s26  ;;  %v349_v37 = vmul.f32 0.0, %v348_v34 }
 0x17f   :  { %v352_v35 = vpop.permute.xlu0 %351 }
 0x180   :  { %v354_v36 = vmul.f32 %v352_v35, %v348_v34 }
 0x182   :  { %356 = vrot.lane.b32.xlu0 %v354_v36, %s3174_s27 }
 0x1f4   :  { %v357_v38 = vpop.permute.xlu0 %356 }
 0x1f5   :  { %v3255_v39 = vadd.f32 %v357_v38, %v349_v37 }
 0x1f7   :  { %3056 = vtanh.f32 %v3255_v39 }
 0x201   :  { %v3057_v46 = vpop.eup %3056 }
 0x202   :  { %362 = vrot.lane.b32.xlu1 %v3057_v46, %s3173_s26 }
 0x274   :  { %v363_v47 = vpop.permute.xlu1 %362 }
 0x275   :  { %v365_v48 = vmul.f32 %v363_v47, %v348_v34 }
 0x277   :  { %367 = vrot.lane.b32.xlu1 %v365_v48, %s3174_s27 }
 0x2e9   :  { %v368_v49 = vpop.permute.xlu1 %367 }
 0x2ea   :  { %2622 = vmatmul.mubr.msk.f32.vlgmr.msra.gmra.mrb[0].mxu1 %vm200_vm5, %v368_v49 }
 0x2eb   :  { %2908 = vmatpush3.bf16.msra.mxu1 %v3206_v5  ;;  %2665 = vmatprep.mubr.msk.f32.mxu1 %vm3170_vm0, %v3171_v1 }
 0x2ec   :  { %2909 = vmatprep.subr.bf16.mxu1 %v3169_v0 }
 0x2ef   :  { %2911 = vmatpush3.bf16.msra.mxu1 %v3212_v11 }
 0x2f0   :  { %2912 = vmatprep.subr.bf16.mxu1 %v3169_v0 }
 0x3bd   :  { %v437_v51 = vpop.f32.mrb[0].mxu1 }
 0x3be   :  { %v3020_v52 = vadd.f32 %v3275_v50, %v437_v51  ;;  %v2623_v53 = vpop.f32.mrb[1].mxu1 }
 0x3c0   :  { %v442_v54 = vmul.f32 %v3020_v52, %v3246_v26 }
 0x3c2   :  { %3058 = vtanh.f32 %v442_v54 }
 0x3cc   :  { %v3059_v55 = vpop.eup %3058 }
 0x3cd   :  { %v444_v56 = vmul.f32 %v3059_v55, %v3246_v26 }
 0x3cf   :  { %v445_v57 = vadd.f32 %v444_v56, %v3249_v32 }
 0x3d1   :  { %448 = vrot.lane.b32.xlu0 %v445_v57, %s3173_s26  ;;  %v446_v60 = vmul.f32 0.0, %v445_v57 }
 0x443   :  { %v449_v58 = vpop.permute.xlu0 %448 }
 0x444   :  { %v451_v59 = vmul.f32 %v449_v58, %v445_v57 }
 0x446   :  { %453 = vrot.lane.b32.xlu1 %v451_v59, %s3174_s27 }
 0x4b8   :  { %v454_v61 = vpop.permute.xlu1 %453 }
 0x4b9   :  { %v3283_v62 = vadd.f32 %v454_v61, %v446_v60  ;;  %v161_v60 = vadd.f32 %v3243_v23, %v3316_v13 }
 0x4bb   :  { %3060 = vtanh.f32 %v3283_v62 }
 0x4c5   :  { %v3061_v8 = vpop.eup %3060 }
 0x4c6   :  { %459 = vrot.lane.b32.xlu0 %v3061_v8, %s3173_s26 }
 0x538   :  { %v460_v9 = vpop.permute.xlu0 %459 }
 0x539   :  { %v462_v10 = vmul.f32 %v460_v9, %v445_v57 }
 0x53b   :  { %464 = vrot.lane.b32.xlu1 %v462_v10, %s3174_s27 }
 0x5ad   :  { %v465_v21 = vpop.permute.xlu1 %464 }
 0x5ae   :  { %2633 = vmatmul.mubr.msk.f32.vlgmr.msra.gmra.mrb[8].mxu0 %vm200_vm5, %v465_v21 }
 0x5af   :  { %2896 = vmatpush3.bf16.msra.mxu0 %v3221_v15  ;;  %2643 = vmatprep.mubr.msk.f32.mxu0 %vm3170_vm0, %v3171_v1 }
 0x5b0   :  { %2897 = vmatprep.subr.bf16.mxu0 %v3169_v0 }
 0x5b3   :  { %2899 = vmatpush3.bf16.msra.mxu0 %v3229_v18 }
 0x5b4   :  { %2900 = vmatprep.subr.bf16.mxu0 %v3169_v0 }
 0x5b6   :  { %2644 = vmatmul.mubr.msk.f32.vlgmr.msra.gmra.mrb[10].mxu0 %vm200_vm5, %v368_v49 }
 0x5b7   :  { %2902 = vmatpush3.bf16.msra.mxu0 %v3258_v43  ;;  %2654 = vmatprep.mubr.msk.f32.mxu0 %vm3170_vm0, %v3171_v1 }
 0x5b8   :  { %2903 = vmatprep.subr.bf16.mxu0 %v3169_v0 }
 0x5bb   :  { %2905 = vmatpush3.bf16.msra.mxu0 %v3261_v45 }
 0x5bc   :  { %2924 = vmatprep.subr.bf16.mxu0 %v3169_v0 }
 0x689   :  { %v604_v24 = vpop.f32.mrb[10].mxu0 }
 0x68a   :  { %v608_v25 = vadd.f32 %v604_v24, %v156_v22  ;;  %v2645_v27 = vpop.f32.mrb[11].mxu0 }
 0x68c   :  { %v609_v28 = vmul.f32 %v608_v25, %v3246_v26 }
 0x68e   :  { %3062 = vtanh.f32 %v609_v28 }
 0x698   :  { %v3063_v29 = vpop.eup %3062 }
 0x699   :  { %v611_v30 = vmul.f32 %v3063_v29, %v3246_v26 }
 0x69b   :  { %v612_v31 = vadd.f32 %v611_v30, %v3249_v32 }
 0x69d   :  { %615 = vrot.lane.b32.xlu0 %v612_v31, %s3173_s26  ;;  %v613_v35 = vmul.f32 %v612_v31, %v3255_v39 }
 0x70f   :  { %v616_v33 = vpop.permute.xlu0 %615 }
 0x710   :  { %v618_v34 = vmul.f32 %v616_v33, %v612_v31 }
 0x712   :  { %620 = vrot.lane.b32.xlu1 %v618_v34, %s3174_s27 }
 0x784   :  { %v621_v20 = vpop.permute.xlu1 %620 }
 0x785   :  { %v623_v36 = vadd.f32 %v621_v20, %v613_v35 }
 0x787   :  { %3064 = vtanh.f32 %v623_v36 }
 0x791   :  { %v3065_v37 = vpop.eup %3064 }
 0x792   :  { %626 = vrot.lane.b32.xlu0 %v3065_v37, %s3173_s26 }
 0x804   :  { %v627_v38 = vpop.permute.xlu0 %626 }
 0x805   :  { %v629_v40 = vmul.f32 %v627_v38, %v612_v31 }
 0x807   :  { %631 = vrot.lane.b32.xlu1 %v629_v40, %s3174_s27 }
 0x879   :  { %v632_v41 = vpop.permute.xlu1 %631 }
 0x87a   :  { %2655 = vmatmul.mubr.msk.f32.vlgmr.msra.gmra.mrb[8].mxu0 %vm200_vm5, %v632_v41 }
 0x87b   :  { %2926 = vmatpush3.bf16.msra.mxu0 %v3206_v5  ;;  %2698 = vmatprep.mubr.msk.f32.mxu0 %vm3170_vm0, %v3171_v1 }
 0x87c   :  { %2927 = vmatprep.subr.bf16.mxu0 %v3169_v0 }
 0x87f   :  { %2929 = vmatpush3.bf16.msra.mxu0 %v3212_v11 }
 0x880   :  { %2930 = vmatprep.subr.bf16.mxu0 %v3169_v0 }
 0x94d   :  { %v701_v39 = vpop.f32.mrb[8].mxu0 }
 0x94e   :  { %v3021_v42 = vadd.f32 %v3275_v50, %v701_v39  ;;  %v2656_v44 = vpop.f32.mrb[9].mxu0 }
 0x94f   :  { %v166_v44 = vadd.f32 %v3314_v12, %v3243_v23 }
 0x950   :  { %v706_v46 = vmul.f32 %v3021_v42, %v3246_v26 }
 0x952   :  { %3066 = vtanh.f32 %v706_v46 }
 0x95c   :  { %v3067_v47 = vpop.eup %3066 }
 0x95d   :  { %v708_v48 = vmul.f32 %v3067_v47, %v3246_v26 }
 0x95f   :  { %v709_v49 = vadd.f32 %v708_v48, %v3249_v32 }
 0x961   :  { %712 = vrot.lane.b32.xlu0 %v709_v49, %s3173_s26  ;;  %v710_v53 = vmul.f32 %v709_v49, %v3283_v62 }
 0x9d3   :  { %v713_v51 = vpop.permute.xlu0 %712 }
 0x9d4   :  { %v715_v52 = vmul.f32 %v713_v51, %v709_v49 }
 0x9d6   :  { %717 = vrot.lane.b32.xlu1 %v715_v52, %s3174_s27 }
 0xa48   :  { %v718_v54 = vpop.permute.xlu1 %717 }
 0xa49   :  { %v720_v55 = vadd.f32 %v718_v54, %v710_v53 }
 0xa4b   :  { %3068 = vtanh.f32 %v720_v55 }
 0xa55   :  { %v3069_v56 = vpop.eup %3068 }
 0xa56   :  { %723 = vrot.lane.b32.xlu0 %v3069_v56, %s3173_s26 }
 0xac8   :  { %v724_v57 = vpop.permute.xlu0 %723 }
 0xac9   :  { %v726_v58 = vmul.f32 %v724_v57, %v709_v49 }
 0xacb   :  { %728 = vrot.lane.b32.xlu1 %v726_v58, %s3174_s27 }
 0xb3d   :  { %v729_v59 = vpop.permute.xlu1 %728 }
 0xb3e   :  { %2666 = vmatmul.mubr.msk.f32.vlgmr.msra.gmra.mrb[4].mxu1 %vm200_vm5, %v729_v59 }
 0xb3f   :  { %2914 = vmatpush3.bf16.msra.mxu1 %v3221_v15  ;;  %2676 = vmatprep.mubr.msk.f32.mxu1 %vm3170_vm0, %v3171_v1 }
 0xb40   :  { %2915 = vmatprep.subr.bf16.mxu1 %v3169_v0 }
 0xb43   :  { %2917 = vmatpush3.bf16.msra.mxu1 %v3229_v18 }
 0xb44   :  { %2918 = vmatprep.subr.bf16.mxu1 %v3169_v0 }
 0xb46   :  { %2677 = vmatmul.mubr.msk.f32.vlgmr.msra.gmra.mrb[6].mxu1 %vm200_vm5, %v632_v41 }
 0xb47   :  { %2920 = vmatpush3.bf16.msra.mxu1 %v3258_v43  ;;  %2687 = vmatprep.mubr.msk.f32.mxu1 %vm3170_vm0, %v3171_v1 }
 0xb48   :  { %2921 = vmatprep.subr.bf16.mxu1 %v3169_v0 }
 0xb4b   :  { %2923 = vmatpush3.bf16.msra.mxu1 %v3261_v45 }
 0xb4c   :  { %2942 = vmatprep.subr.bf16.mxu1 %v3169_v0 }
 0xc19   :  { %v868_v61 = vpop.f32.mrb[6].mxu1 }
 0xc1a   :  { %v872_v62 = vadd.f32 %v868_v61, %v161_v60  ;;  %v2678_v63 = vpop.f32.mrb[7].mxu1 }
 0xc1c   :  { %v873_v2 = vmul.f32 %v872_v62, %v3246_v26 }
 0xc1e   :  { %3070 = vtanh.f32 %v873_v2 }
 0xc28   :  { %v3071_v3 = vpop.eup %3070 }
 0xc29   :  { %v875_v4 = vmul.f32 %v3071_v3, %v3246_v26 }
 0xc2b   :  { %v876_v6 = vadd.f32 %v875_v4, %v3249_v32 }
 0xc2d   :  { %879 = vrot.lane.b32.xlu0 %v876_v6, %s3173_s26  ;;  %v877_v9 = vmul.f32 %v876_v6, %v623_v36 }
 0xc9f   :  { %v880_v7 = vpop.permute.xlu0 %879 }
 0xca0   :  { %v882_v8 = vmul.f32 %v880_v7, %v876_v6 }
 0xca2   :  { %884 = vrot.lane.b32.xlu1 %v882_v8, %s3174_s27 }
 0xd14   :  { %v885_v10 = vpop.permute.xlu1 %884 }
 0xd15   :  { %v887_v13 = vadd.f32 %v885_v10, %v877_v9 }
 0xd17   :  { %3072 = vtanh.f32 %v887_v13 }
 0xd21   :  { %v3073_v21 = vpop.eup %3072 }
 0xd22   :  { %890 = vrot.lane.b32.xlu0 %v3073_v21, %s3173_s26 }
 0xd94   :  { %v891_v22 = vpop.permute.xlu0 %890 }
 0xd95   :  { %v893_v24 = vmul.f32 %v891_v22, %v876_v6 }
 0xd97   :  { %895 = vrot.lane.b32.xlu1 %v893_v24, %s3174_s27 }
 0xe09   :  { %v896_v25 = vpop.permute.xlu1 %895 }
 0xe0a   :  { %2688 = vmatmul.mubr.msk.f32.vlgmr.msra.gmra.mrb[4].mxu1 %vm200_vm5, %v896_v25 }
 0xe0b   :  { %2944 = vmatpush3.bf16.msra.mxu1 %v3206_v5  ;;  %2731 = vmatprep.mubr.msk.f32.mxu1 %vm3170_vm0, %v3171_v1 }
 0xe0c   :  { %2945 = vmatprep.subr.bf16.mxu1 %v3169_v0 }
 0xe0f   :  { %2947 = vmatpush3.bf16.msra.mxu1 %v3212_v11 }
 0xe10   :  { %2948 = vmatprep.subr.bf16.mxu1 %v3169_v0 }
 0xedd   :  { %v965_v27 = vpop.f32.mrb[4].mxu1 }
 0xede   :  { %v3022_v28 = vadd.f32 %v3275_v50, %v965_v27  ;;  %v2689_v29 = vpop.f32.mrb[5].mxu1 }
 0xee0   :  { %v970_v30 = vmul.f32 %v3022_v28, %v3246_v26  ;;  %v171_v28 = vadd.f32 %v3243_v23, %v3320_v16 }
 0xee2   :  { %3074 = vtanh.f32 %v970_v30 }
 0xeec   :  { %v3075_v31 = vpop.eup %3074 }
 0xeed   :  { %v972_v33 = vmul.f32 %v3075_v31, %v3246_v26 }
 0xeef   :  { %v973_v34 = vadd.f32 %v972_v33, %v3249_v32 }
 0xef1   :  { %976 = vrot.lane.b32.xlu0 %v973_v34, %s3173_s26  ;;  %v974_v36 = vmul.f32 %v973_v34, %v720_v55 }
 0xf63   :  { %v977_v35 = vpop.permute.xlu0 %976 }
 0xf64   :  { %v979_v20 = vmul.f32 %v977_v35, %v973_v34 }
 0xf66   :  { %981 = vrot.lane.b32.xlu1 %v979_v20, %s3174_s27 }
 0xfd8   :  { %v982_v37 = vpop.permute.xlu1 %981 }
 0xfd9   :  { %v984_v38 = vadd.f32 %v982_v37, %v974_v36 }
 0xfdb   :  { %3076 = vtanh.f32 %v984_v38 }
 0xfe5   :  { %v3077_v40 = vpop.eup %3076 }
 0xfe6   :  { %987 = vrot.lane.b32.xlu0 %v3077_v40, %s3173_s26 }
0x1058   :  { %v988_v41 = vpop.permute.xlu0 %987 }
0x1059   :  { %v990_v39 = vmul.f32 %v988_v41, %v973_v34 }
0x105b   :  { %992 = vrot.lane.b32.xlu1 %v990_v39, %s3174_s27 }
0x10cd   :  { %v993_v42 = vpop.permute.xlu1 %992 }
0x10ce   :  { %2699 = vmatmul.mubr.msk.f32.vlgmr.msra.gmra.mrb[12].mxu0 %vm200_vm5, %v993_v42 }
0x10cf   :  { %2932 = vmatpush3.bf16.msra.mxu0 %v3221_v15  ;;  %2709 = vmatprep.mubr.msk.f32.mxu0 %vm3170_vm0, %v3171_v1 }
0x10d0   :  { %2933 = vmatprep.subr.bf16.mxu0 %v3169_v0 }
0x10d3   :  { %2935 = vmatpush3.bf16.msra.mxu0 %v3229_v18 }
0x10d4   :  { %2936 = vmatprep.subr.bf16.mxu0 %v3169_v0 }
0x10d6   :  { %2710 = vmatmul.mubr.msk.f32.vlgmr.msra.gmra.mrb[14].mxu0 %vm200_vm5, %v896_v25 }
0x10d7   :  { %2938 = vmatpush3.bf16.msra.mxu0 %v3258_v43  ;;  %2720 = vmatprep.mubr.msk.f32.mxu0 %vm3170_vm0, %v3171_v1 }
0x10d8   :  { %2939 = vmatprep.subr.bf16.mxu0 %v3169_v0 }
0x10db   :  { %2941 = vmatpush3.bf16.msra.mxu0 %v3261_v45 }
0x10dc   :  { %2960 = vmatprep.subr.bf16.mxu0 %v3169_v0 }
0x11a9   :  { %v1132_v46 = vpop.f32.mrb[14].mxu0 }
0x11aa   :  { %v1136_v47 = vadd.f32 %v1132_v46, %v166_v44  ;;  %v2711_v48 = vpop.f32.mrb[15].mxu0 }
0x11ac   :  { %v1137_v49 = vmul.f32 %v1136_v47, %v3246_v26 }
0x11ae   :  { %3078 = vtanh.f32 %v1137_v49 }
0x11b8   :  { %v3079_v51 = vpop.eup %3078 }
0x11b9   :  { %v1139_v52 = vmul.f32 %v3079_v51, %v3246_v26 }
0x11bb   :  { %v1140_v53 = vadd.f32 %v1139_v52, %v3249_v32 }
0x11bd   :  { %1143 = vrot.lane.b32.xlu0 %v1140_v53, %s3173_s26  ;;  %v1141_v56 = vmul.f32 %v1140_v53, %v887_v13 }
0x122f   :  { %v1144_v54 = vpop.permute.xlu0 %1143 }
0x1230   :  { %v1146_v55 = vmul.f32 %v1144_v54, %v1140_v53 }
0x1232   :  { %1148 = vrot.lane.b32.xlu1 %v1146_v55, %s3174_s27 }
0x12a4   :  { %v1149_v57 = vpop.permute.xlu1 %1148 }
0x12a5   :  { %v1151_v12 = vadd.f32 %v1149_v57, %v1141_v56 }
0x12a7   :  { %3080 = vtanh.f32 %v1151_v12 }
0x12b1   :  { %v3081_v58 = vpop.eup %3080 }
0x12b2   :  { %1154 = vrot.lane.b32.xlu0 %v3081_v58, %s3173_s26 }
0x1324   :  { %v1155_v59 = vpop.permute.xlu0 %1154 }
0x1325   :  { %v1157_v60 = vmul.f32 %v1155_v59, %v1140_v53 }
0x1327   :  { %1159 = vrot.lane.b32.xlu1 %v1157_v60, %s3174_s27 }
0x1399   :  { %v1160_v61 = vpop.permute.xlu1 %1159 }
0x139a   :  { %2721 = vmatmul.mubr.msk.f32.vlgmr.msra.gmra.mrb[12].mxu0 %vm200_vm5, %v1160_v61 }
0x139b   :  { %2962 = vmatpush3.bf16.msra.mxu0 %v3206_v5  ;;  %2764 = vmatprep.mubr.msk.f32.mxu0 %vm3170_vm0, %v3171_v1 }
0x139c   :  { %2963 = vmatprep.subr.bf16.mxu0 %v3169_v0 }
0x139f   :  { %2965 = vmatpush3.bf16.msra.mxu0 %v3212_v11 }
0x13a0   :  { %2966 = vmatprep.subr.bf16.mxu0 %v3169_v0 }
0x146d   :  { %v1229_v62 = vpop.f32.mrb[12].mxu0 }
0x146e   :  { %v3023_v63 = vadd.f32 %v3275_v50, %v1229_v62  ;;  %v2722_v2 = vpop.f32.mrb[13].mxu0  ;;  %v176_v62 = vadd.f32 %v3318_v14, %v3243_v23 }
0x1470   :  { %v1234_v3 = vmul.f32 %v3023_v63, %v3246_v26 }
0x1472   :  { %3082 = vtanh.f32 %v1234_v3 }
0x147c   :  { %v3083_v4 = vpop.eup %3082 }
0x147d   :  { %v1236_v6 = vmul.f32 %v3083_v4, %v3246_v26 }
0x147f   :  { %v1237_v7 = vadd.f32 %v1236_v6, %v3249_v32 }
0x1481   :  { %1240 = vrot.lane.b32.xlu0 %v1237_v7, %s3173_s26  ;;  %v1238_v10 = vmul.f32 %v1237_v7, %v984_v38 }
0x14f3   :  { %v1241_v8 = vpop.permute.xlu0 %1240 }
0x14f4   :  { %v1243_v9 = vmul.f32 %v1241_v8, %v1237_v7 }
0x14f6   :  { %1245 = vrot.lane.b32.xlu1 %v1243_v9, %s3174_s27 }
0x1568   :  { %v1246_v13 = vpop.permute.xlu1 %1245 }
0x1569   :  { %v1248_v21 = vadd.f32 %v1246_v13, %v1238_v10 }
0x156b   :  { %3084 = vtanh.f32 %v1248_v21 }
0x1575   :  { %v3085_v22 = vpop.eup %3084 }
0x1576   :  { %1251 = vrot.lane.b32.xlu0 %v3085_v22, %s3173_s26 }
0x15e8   :  { %v1252_v24 = vpop.permute.xlu0 %1251 }
0x15e9   :  { %v1254_v25 = vmul.f32 %v1252_v24, %v1237_v7 }
0x15eb   :  { %1256 = vrot.lane.b32.xlu1 %v1254_v25, %s3174_s27 }
0x165d   :  { %v1257_v27 = vpop.permute.xlu1 %1256 }
0x165e   :  { %2732 = vmatmul.mubr.msk.f32.vlgmr.msra.gmra.mrb[8].mxu1 %vm200_vm5, %v1257_v27 }
0x165f   :  { %2950 = vmatpush3.bf16.msra.mxu1 %v3221_v15  ;;  %2742 = vmatprep.mubr.msk.f32.mxu1 %vm3170_vm0, %v3171_v1 }
0x1660   :  { %2951 = vmatprep.subr.bf16.mxu1 %v3169_v0 }
0x1663   :  { %2953 = vmatpush3.bf16.msra.mxu1 %v3229_v18 }
0x1664   :  { %2954 = vmatprep.subr.bf16.mxu1 %v3169_v0 }
0x1666   :  { %2743 = vmatmul.mubr.msk.f32.vlgmr.msra.gmra.mrb[10].mxu1 %vm200_vm5, %v1160_v61 }
0x1667   :  { %2956 = vmatpush3.bf16.msra.mxu1 %v3258_v43  ;;  %2753 = vmatprep.mubr.msk.f32.mxu1 %vm3170_vm0, %v3171_v1 }
0x1668   :  { %2957 = vmatprep.subr.bf16.mxu1 %v3169_v0 }
0x166b   :  { %2959 = vmatpush3.bf16.msra.mxu1 %v3261_v45 }
0x166c   :  { %2978 = vmatprep.subr.bf16.mxu1 %v3169_v0 }
0x1739   :  { %v1396_v29 = vpop.f32.mrb[10].mxu1 }
0x173a   :  { %v1400_v30 = vadd.f32 %v1396_v29, %v171_v28  ;;  %v2744_v31 = vpop.f32.mrb[11].mxu1 }
0x173c   :  { %v1401_v33 = vmul.f32 %v1400_v30, %v3246_v26 }
0x173e   :  { %3086 = vtanh.f32 %v1401_v33 }
0x1748   :  { %v3087_v34 = vpop.eup %3086 }
0x1749   :  { %v1403_v35 = vmul.f32 %v3087_v34, %v3246_v26 }
0x174b   :  { %v1404_v20 = vadd.f32 %v1403_v35, %v3249_v32 }
0x174d   :  { %1407 = vrot.lane.b32.xlu0 %v1404_v20, %s3173_s26  ;;  %v1405_v38 = vmul.f32 %v1404_v20, %v1151_v12 }
0x17bf   :  { %v1408_v36 = vpop.permute.xlu0 %1407 }
0x17c0   :  { %v1410_v37 = vmul.f32 %v1408_v36, %v1404_v20 }
0x17c2   :  { %1412 = vrot.lane.b32.xlu1 %v1410_v37, %s3174_s27 }
0x1834   :  { %v1413_v40 = vpop.permute.xlu1 %1412 }
0x1835   :  { %v1415_v16 = vadd.f32 %v1413_v40, %v1405_v38 }
0x1837   :  { %3088 = vtanh.f32 %v1415_v16 }
0x1841   :  { %v3089_v41 = vpop.eup %3088 }
0x1842   :  { %1418 = vrot.lane.b32.xlu0 %v3089_v41, %s3173_s26 }
0x18b4   :  { %v1419_v39 = vpop.permute.xlu0 %1418 }
0x18b5   :  { %v1421_v42 = vmul.f32 %v1419_v39, %v1404_v20  ;;  %v181_v39 = vadd.f32 %v3243_v23, %v3324_v19 }
0x18b7   :  { %1423 = vrot.lane.b32.xlu1 %v1421_v42, %s3174_s27 }
0x1929   :  { %v1424_v44 = vpop.permute.xlu1 %1423 }
0x192a   :  { %2754 = vmatmul.mubr.msk.f32.vlgmr.msra.gmra.mrb[8].mxu1 %vm200_vm5, %v1424_v44 }
0x192b   :  { %2980 = vmatpush3.bf16.msra.mxu1 %v3206_v5  ;;  %2797 = vmatprep.mubr.msk.f32.mxu1 %vm3170_vm0, %v3171_v1 }
0x192c   :  { %2981 = vmatprep.subr.bf16.mxu1 %v3169_v0 }
0x192f   :  { %2983 = vmatpush3.bf16.msra.mxu1 %v3212_v11 }
0x1930   :  { %2984 = vmatprep.subr.bf16.mxu1 %v3169_v0 }
0x19fd   :  { %v1493_v46 = vpop.f32.mrb[8].mxu1 }
0x19fe   :  { %v3024_v47 = vadd.f32 %v3275_v50, %v1493_v46  ;;  %v2755_v48 = vpop.f32.mrb[9].mxu1 }
0x1a00   :  { %v1498_v49 = vmul.f32 %v3024_v47, %v3246_v26 }
0x1a02   :  { %3090 = vtanh.f32 %v1498_v49 }
0x1a0c   :  { %v3091_v51 = vpop.eup %3090 }
0x1a0d   :  { %v1500_v52 = vmul.f32 %v3091_v51, %v3246_v26 }
0x1a0f   :  { %v1501_v53 = vadd.f32 %v1500_v52, %v3249_v32 }
0x1a11   :  { %1504 = vrot.lane.b32.xlu0 %v1501_v53, %s3173_s26  ;;  %v1502_v56 = vmul.f32 %v1501_v53, %v1248_v21 }
0x1a83   :  { %v1505_v54 = vpop.permute.xlu0 %1504 }
0x1a84   :  { %v1507_v55 = vmul.f32 %v1505_v54, %v1501_v53 }
0x1a86   :  { %1509 = vrot.lane.b32.xlu1 %v1507_v55, %s3174_s27 }
0x1af8   :  { %v1510_v57 = vpop.permute.xlu1 %1509 }
0x1af9   :  { %v1512_v12 = vadd.f32 %v1510_v57, %v1502_v56 }
0x1afb   :  { %3092 = vtanh.f32 %v1512_v12 }
0x1b05   :  { %v3093_v58 = vpop.eup %3092 }
0x1b06   :  { %1515 = vrot.lane.b32.xlu0 %v3093_v58, %s3173_s26 }
0x1b78   :  { %v1516_v59 = vpop.permute.xlu0 %1515 }
0x1b79   :  { %v1518_v60 = vmul.f32 %v1516_v59, %v1501_v53 }
0x1b7b   :  { %1520 = vrot.lane.b32.xlu1 %v1518_v60, %s3174_s27 }
0x1bed   :  { %v1521_v61 = vpop.permute.xlu1 %1520 }
0x1bee   :  { %2765 = vmatmul.mubr.msk.f32.vlgmr.msra.gmra.mrb[16].mxu0 %vm200_vm5, %v1521_v61 }
0x1bef   :  { %2968 = vmatpush3.bf16.msra.mxu0 %v3221_v15  ;;  %2775 = vmatprep.mubr.msk.f32.mxu0 %vm3170_vm0, %v3171_v1 }
0x1bf0   :  { %2969 = vmatprep.subr.bf16.mxu0 %v3169_v0 }
0x1bf3   :  { %2971 = vmatpush3.bf16.msra.mxu0 %v3229_v18 }
0x1bf4   :  { %2972 = vmatprep.subr.bf16.mxu0 %v3169_v0 }
0x1bf6   :  { %2776 = vmatmul.mubr.msk.f32.vlgmr.msra.gmra.mrb[18].mxu0 %vm200_vm5, %v1424_v44 }
0x1bf7   :  { %2974 = vmatpush3.bf16.msra.mxu0 %v3258_v43  ;;  %2786 = vmatprep.mubr.msk.f32.mxu0 %vm3170_vm0, %v3171_v1 }
0x1bf8   :  { %2975 = vmatprep.subr.bf16.mxu0 %v3169_v0 }
0x1bfb   :  { %2977 = vmatpush3.bf16.msra.mxu0 %v3261_v45 }
0x1bfc   :  { %2996 = vmatprep.subr.bf16.mxu0 %v3169_v0 }
0x1cc9   :  { %v1660_v63 = vpop.f32.mrb[18].mxu0 }
0x1cca   :  { %v1664_v2 = vadd.f32 %v1660_v63, %v176_v62  ;;  %v2777_v3 = vpop.f32.mrb[19].mxu0 }
0x1ccc   :  { %v1665_v4 = vmul.f32 %v1664_v2, %v3246_v26 }
0x1cce   :  { %3094 = vtanh.f32 %v1665_v4 }
0x1cd8   :  { %v3095_v6 = vpop.eup %3094 }
0x1cd9   :  { %v1667_v7 = vmul.f32 %v3095_v6, %v3246_v26 }
0x1cdb   :  { %v1668_v8 = vadd.f32 %v1667_v7, %v3249_v32 }
0x1cdd   :  { %1671 = vrot.lane.b32.xlu0 %v1668_v8, %s3173_s26  ;;  %v1669_v13 = vmul.f32 %v1668_v8, %v1415_v16 }
0x1d4f   :  { %v1672_v9 = vpop.permute.xlu0 %1671 }
0x1d50   :  { %v1674_v10 = vmul.f32 %v1672_v9, %v1668_v8 }
0x1d52   :  { %1676 = vrot.lane.b32.xlu1 %v1674_v10, %s3174_s27 }
0x1dc4   :  { %v1677_v21 = vpop.permute.xlu1 %1676 }
0x1dc5   :  { %v1679_v14 = vadd.f32 %v1677_v21, %v1669_v13 }
0x1dc7   :  { %3096 = vtanh.f32 %v1679_v14 }
0x1dd1   :  { %v3097_v22 = vpop.eup %3096 }
0x1dd2   :  { %1682 = vrot.lane.b32.xlu0 %v3097_v22, %s3173_s26 }
0x1e44   :  { %v1683_v24 = vpop.permute.xlu0 %1682 }
0x1e45   :  { %v1685_v25 = vmul.f32 %v1683_v24, %v1668_v8 }
0x1e47   :  { %1687 = vrot.lane.b32.xlu1 %v1685_v25, %s3174_s27 }
0x1eb9   :  { %v1688_v27 = vpop.permute.xlu1 %1687 }
0x1eba   :  { %2787 = vmatmul.mubr.msk.f32.vlgmr.msra.gmra.mrb[16].mxu0 %vm200_vm5, %v1688_v27 }
0x1ebb   :  { %2998 = vmatpush3.bf16.msra.mxu0 %v3206_v5  ;;  %2830 = vmatprep.mubr.msk.f32.mxu0 %vm3170_vm0, %v3171_v1 }
0x1ebc   :  { %2999 = vmatprep.subr.bf16.mxu0 %v3169_v0 }
0x1ebf   :  { %3001 = vmatpush3.bf16.msra.mxu0 %v3212_v11 }
0x1ec0   :  { %3002 = vmatprep.subr.bf16.mxu0 %v3169_v0 }
0x1f8d   :  { %v1757_v28 = vpop.f32.mrb[16].mxu0 }
0x1f8e   :  { %v3025_v29 = vadd.f32 %v3275_v50, %v1757_v28  ;;  %v2788_v30 = vpop.f32.mrb[17].mxu0 }
0x1f90   :  { %v1762_v31 = vmul.f32 %v3025_v29, %v3246_v26 }
0x1f92   :  { %3098 = vtanh.f32 %v1762_v31 }
0x1f9c   :  { %v3099_v33 = vpop.eup %3098 }
0x1f9d   :  { %v1764_v34 = vmul.f32 %v3099_v33, %v3246_v26 }
0x1f9f   :  { %v1765_v5 = vadd.f32 %v1764_v34, %v3249_v32 }
0x1fa1   :  { %1768 = vrot.lane.b32.xlu0 %v1765_v5, %s3173_s26  ;;  %v1766_v11 = vmul.f32 %v1765_v5, %v1512_v12 }
0x2013   :  { %v1769_v35 = vpop.permute.xlu0 %1768 }
0x2014   :  { %v1771_v20 = vmul.f32 %v1769_v35, %v1765_v5 }
0x2016   :  { %1773 = vrot.lane.b32.xlu1 %v1771_v20, %s3174_s27 }
0x2088   :  { %v1774_v36 = vpop.permute.xlu1 %1773 }
0x2089   :  { %v1776_v37 = vadd.f32 %v1774_v36, %v1766_v11 }
0x208b   :  { %3100 = vtanh.f32 %v1776_v37 }
0x2095   :  { %v3101_v38 = vpop.eup %3100 }
0x2096   :  { %1779 = vrot.lane.b32.xlu0 %v3101_v38, %s3173_s26 }
0x2108   :  { %v1780_v40 = vpop.permute.xlu0 %1779 }
0x2109   :  { %v1782_v16 = vmul.f32 %v1780_v40, %v1765_v5 }
0x210b   :  { %1784 = vrot.lane.b32.xlu1 %v1782_v16, %s3174_s27 }
0x217d   :  { %v1785_v41 = vpop.permute.xlu1 %1784 }
0x217e   :  { %2798 = vmatmul.mubr.msk.f32.vlgmr.msra.gmra.mrb[12].mxu1 %vm200_vm5, %v1785_v41 }
0x217f   :  { %2986 = vmatpush3.bf16.msra.mxu1 %v3221_v15  ;;  %2808 = vmatprep.mubr.msk.f32.mxu1 %vm3170_vm0, %v3171_v1 }
0x2180   :  { %2987 = vmatprep.subr.bf16.mxu1 %v3169_v0 }
0x2183   :  { %2989 = vmatpush3.bf16.msra.mxu1 %v3229_v18 }
0x2184   :  { %2990 = vmatprep.subr.bf16.mxu1 %v3169_v0 }
0x2186   :  { %2809 = vmatmul.mubr.msk.f32.vlgmr.msra.gmra.mrb[14].mxu1 %vm200_vm5, %v1688_v27 }
0x2187   :  { %2992 = vmatpush3.bf16.msra.mxu1 %v3258_v43  ;;  %2819 = vmatprep.mubr.msk.f32.mxu1 %vm3170_vm0, %v3171_v1 }
0x2188   :  { %2993 = vmatprep.subr.bf16.mxu1 %v3169_v0 }
0x218b   :  { %2995 = vmatpush3.bf16.msra.mxu1 %v3261_v45 }
0x218c   :  { %3014 = vmatprep.subr.bf16.mxu1 %v3169_v0 }
0x2259   :  { %v1924_v42 = vpop.f32.mrb[14].mxu1 }
0x225a   :  { %v1928_v44 = vadd.f32 %v1924_v42, %v181_v39  ;;  %v2810_v46 = vpop.f32.mrb[15].mxu1 }
0x225b   :  { %v44_v46 = vld [vmem:[#allocation2 + $0x90] sm:$0xff] }
0x225c   :  { %v1929_v47 = vmul.f32 %v1928_v44, %v3246_v26  ;;  %v43_v44 = vld [vmem:[#allocation2 + $0x88] sm:$0xff] }
0x225e   :  { %3102 = vtanh.f32 %v1929_v47 }
0x2268   :  { %v3103_v48 = vpop.eup %3102 }
0x2269   :  { %v1931_v49 = vmul.f32 %v3103_v48, %v3246_v26  ;;  %v45_v48 = vld [vmem:[#allocation2 + $0x98] sm:$0xff] }
0x226b   :  { %v1932_v51 = vadd.f32 %v1931_v49, %v3249_v32  ;;  %v3018_v49 = vpack.c.bf16 %v45_v48, %v44_v46 }
0x226d   :  { %1935 = vrot.lane.b32.xlu0 %v1932_v51, %s3173_s26  ;;  %v1933_v54 = vmul.f32 %v1932_v51, %v1679_v14 }
0x22df   :  { %v1936_v52 = vpop.permute.xlu0 %1935 }
0x22e0   :  { %v1938_v53 = vmul.f32 %v1936_v52, %v1932_v51 }
0x22e2   :  { %1940 = vrot.lane.b32.xlu1 %v1938_v53, %s3174_s27  ;;  %v2438_v53 = vld [vmem:[#allocation2 + $0xa0] ss:$0 sm:$0xff] }
0x2354   :  { %v1941_v55 = vpop.permute.xlu1 %1940 }
0x2355   :  { %v1943_v19 = vadd.f32 %v1941_v55, %v1933_v54 }
0x2357   :  { %3104 = vtanh.f32 %v1943_v19 }
0x2361   :  { %v3105_v56 = vpop.eup %3104 }
0x2362   :  { %1946 = vrot.lane.b32.xlu0 %v3105_v56, %s3173_s26 }
0x23d4   :  { %v1947_v57 = vpop.permute.xlu0 %1946 }
0x23d5   :  { %v1949_v12 = vmul.f32 %v1947_v57, %v1932_v51 }
0x23d7   :  { %1951 = vrot.lane.b32.xlu1 %v1949_v12, %s3174_s27 }
0x2449   :  { %v1952_v58 = vpop.permute.xlu1 %1951 }
0x244a   :  { %2820 = vmatmul.mubr.msk.f32.vlgmr.msra.gmra.mrb[12].mxu1 %vm200_vm5, %v1952_v58 }
0x244b   :  { %2863 = vmatprep.mubr.msk.f32.mxu1 %vm3170_vm0, %v3171_v1 }
0x251d   :  { %v2021_v59 = vpop.f32.mrb[12].mxu1 }
0x251e   :  { %v3026_v60 = vadd.f32 %v3275_v50, %v2021_v59  ;;  %v2821_v61 = vpop.f32.mrb[13].mxu1 }
0x2520   :  { %v2026_v62 = vmul.f32 %v3026_v60, %v3246_v26 }
0x2522   :  { %3106 = vtanh.f32 %v2026_v62 }
0x252c   :  { %v3107_v63 = vpop.eup %3106 }
0x252d   :  { %v2028_v2 = vmul.f32 %v3107_v63, %v3246_v26 }
0x252f   :  { %v2029_v3 = vadd.f32 %v2028_v2, %v3249_v32 }
0x2531   :  { %2032 = vrot.lane.b32.xlu0 %v2029_v3, %s3173_s26  ;;  %v2030_v7 = vmul.f32 %v2029_v3, %v1776_v37 }
0x25a3   :  { %v2033_v4 = vpop.permute.xlu0 %2032 }
0x25a4   :  { %v2035_v6 = vmul.f32 %v2033_v4, %v2029_v3 }
0x25a6   :  { %2037 = vrot.lane.b32.xlu1 %v2035_v6, %s3174_s27 }
0x2618   :  { %v2038_v8 = vpop.permute.xlu1 %2037 }
0x2619   :  { %v2040_v9 = vadd.f32 %v2038_v8, %v2030_v7 }
0x261b   :  { %3108 = vtanh.f32 %v2040_v9 }
0x2625   :  { %v3109_v10 = vpop.eup %3108 }
0x2626   :  { %2043 = vrot.lane.b32.xlu0 %v3109_v10, %s3173_s26 }
0x2698   :  { %v2044_v13 = vpop.permute.xlu0 %2043 }
0x2699   :  { %v2046_v21 = vmul.f32 %v2044_v13, %v2029_v3 }
0x269b   :  { %2048 = vrot.lane.b32.xlu1 %v2046_v21, %s3174_s27 }
0x270d   :  { %v2049_v14 = vpop.permute.xlu1 %2048 }
0x270e   :  { %2831 = vmatmul.mubr.msk.f32.vlgmr.msra.gmra.mrb[20].mxu0 %vm200_vm5, %v2049_v14 }
0x270f   :  { %3004 = vmatpush3.bf16.msra.mxu0 %v3221_v15  ;;  %2841 = vmatprep.mubr.msk.f32.mxu0 %vm3170_vm0, %v3171_v1  ;;  %v186_v15 = vadd.f32 %v3322_v17, %v3243_v23 }
0x2710   :  { %3005 = vmatprep.subr.bf16.mxu0 %v3169_v0 }
0x2713   :  { %3007 = vmatpush3.bf16.msra.mxu0 %v3229_v18 }
0x2714   :  { %3008 = vmatprep.subr.bf16.mxu0 %v3169_v0 }
0x2716   :  { %2842 = vmatmul.mubr.msk.f32.vlgmr.msra.gmra.mrb[22].mxu0 %vm200_vm5, %v1952_v58 }
0x2717   :  { %3010 = vmatpush3.bf16.msra.mxu0 %v3258_v43  ;;  %2852 = vmatprep.mubr.msk.f32.mxu0 %vm3170_vm0, %v3171_v1 }
0x2718   :  { %3011 = vmatprep.subr.bf16.mxu0 %v3169_v0 }
0x271b   :  { %3013 = vmatpush3.bf16.msra.mxu0 %v3261_v45 }
0x27e9   :  { %v2188_v22 = vpop.f32.mrb[22].mxu0 }
0x27ea   :  { %v2192_v24 = vadd.f32 %v2188_v22, %v186_v15  ;;  %v2843_v25 = vpop.f32.mrb[23].mxu0 }
0x27ec   :  { %v2193_v18 = vmul.f32 %v2192_v24, %v3246_v26 }
0x27ee   :  { %3110 = vtanh.f32 %v2193_v18 }
0x27f8   :  { %v3111_v27 = vpop.eup %3110 }
0x27f9   :  { %v2195_v28 = vmul.f32 %v3111_v27, %v3246_v26 }
0x27fb   :  { %v2196_v43 = vadd.f32 %v2195_v28, %v3249_v32 }
0x27fd   :  { %2199 = vrot.lane.b32.xlu0 %v2196_v43, %s3173_s26  ;;  %v2197_v45 = vmul.f32 %v2196_v43, %v1943_v19 }
0x286f   :  { %v2200_v1 = vpop.permute.xlu0 %2199 }
0x2870   :  { %v2202_v29 = vmul.f32 %v2200_v1, %v2196_v43 }
0x2872   :  { %2204 = vrot.lane.b32.xlu1 %v2202_v29, %s3174_s27 }
0x28e4   :  { %v2205_v30 = vpop.permute.xlu1 %2204 }
0x28e5   :  { %v2207_v23 = vadd.f32 %v2205_v30, %v2197_v45 }
0x28e7   :  { %3112 = vtanh.f32 %v2207_v23 }
0x28f1   :  { %v3113_v17 = vpop.eup %3112 }
0x28f2   :  { %2210 = vrot.lane.b32.xlu0 %v3113_v17, %s3173_s26 }
0x2964   :  { %v2211_v31 = vpop.permute.xlu0 %2210 }
0x2965   :  { %v2213_v33 = vmul.f32 %v2211_v31, %v2196_v43 }
0x2967   :  { %2215 = vrot.lane.b32.xlu1 %v2213_v33, %s3174_s27 }
0x29d9   :  { %v2216_v34 = vpop.permute.xlu1 %2215 }
0x29da   :  { %2853 = vmatmul.mubr.msk.f32.vlgmr.msra.gmra.mrb[20].mxu0 %vm200_vm5, %v2216_v34 }
0x2aad   :  { %v2285_v5 = vpop.f32.mrb[20].mxu0 }
0x2aae   :  { %v3027_v35 = vadd.f32 %v3275_v50, %v2285_v5  ;;  %v2854_v20 = vpop.f32.mrb[21].mxu0  ;;  %v42_v50 = vld [vmem:[#allocation2 + $0x80] sm:$0xff] }
0x2aaf   :  { %v3015_v47 = vpack.c.bf16 %v43_v44, %v42_v50 }
0x2ab0   :  { %v2290_v11 = vmul.f32 %v3027_v35, %v3246_v26 }
0x2ab1   :  { %3016 = vmatpush3.bf16.msra.mxu1 %v3015_v47 }
0x2ab2   :  { %3114 = vtanh.f32 %v2290_v11  ;;  %3017 = vmatprep.subr.bf16.mxu1 %v3169_v0 }
0x2ab5   :  { %3019 = vmatpush3.bf16.msra.mxu1 %v3018_v49 }
0x2abc   :  { %v3115_v36 = vpop.eup %3114 }
0x2abd   :  { %v2292_v37 = vmul.f32 %v3115_v36, %v3246_v26 }
0x2abf   :  { %v2293_v38 = vadd.f32 %v2292_v37, %v3249_v32 }
0x2ac1   :  { %2296 = vrot.lane.b32.xlu0 %v2293_v38, %s3173_s26  ;;  %v2294_v41 = vmul.f32 %v2293_v38, %v2040_v9 }
0x2b33   :  { %v2297_v40 = vpop.permute.xlu0 %2296 }
0x2b34   :  { %v2299_v16 = vmul.f32 %v2297_v40, %v2293_v38 }
0x2b36   :  { %2301 = vrot.lane.b32.xlu1 %v2299_v16, %s3174_s27 }
0x2ba8   :  { %v2302_v39 = vpop.permute.xlu1 %2301 }
0x2ba9   :  { %v2304_v42 = vadd.f32 %v2302_v39, %v2294_v41 }
0x2bab   :  { %3116 = vtanh.f32 %v2304_v42 }
0x2bb5   :  { %v3117_v26 = vpop.eup %3116 }
0x2bb6   :  { %2307 = vrot.lane.b32.xlu0 %v3117_v26, %s3173_s26 }
0x2c28   :  { %v2308_v32 = vpop.permute.xlu0 %2307 }
0x2c29   :  { %v2310_v51 = vmul.f32 %v2308_v32, %v2293_v38 }
0x2c2b   :  { %2316 = vrot.lane.b32.xlu1 %v2310_v51, %s3174_s27 }
0x2c9d   :  { %v2317_v52 = vpop.permute.xlu1 %2316 }
0x2c9e   :  { %2864 = vmatmul.mubr.msk.f32.vlgmr.msra.gmra.mrb[16].mxu1 %vm200_vm5, %v2317_v52 }
0x2d71   :  { %v2386_v54 = vpop.f32.mrb[16].mxu1 }
0x2d72   :  { %v2387_v55 = vadd.f32 %v2438_v53, %v2386_v54  ;;  %v2865_v19 = vpop.f32.mrb[17].mxu1 }
0x2d74   :  { %2390 = vst [vmem:[#allocation5] sm:$0xff] %v2387_v55 }
0x2d75   :  { %3151 = shalt.err (!%p3148_p12)
}
0x2d76   :  { %s3152_s16 = scalar_lea.hbm %s3599_s2, 128 }
0x2d77   :  { %p3153_p13 = scmp.ne.s32.totalorder %s3599_s2, %s3152_s16  ;;  %p3156_p0 = scmp.lt.u32.totalorder %s3152_s16, %s3599_s2 }
0x2d79   :  { %p3158_p1 = pnand %p3156_p0, %p3153_p13 }
0x2d7b   :  { %3161 = shalt.err (!%p3158_p1)
}
0x2d7c   :  { %2400 = dma.vmem_to_hbm [thread:$0]  %s2398_s12, 128, %s3599_s2, [#allocation4]  }
0x2d7d   :  { %3164 = dma.done.wait [#allocation4], 128  }
0x2d7e   :  { %3165 = vsyncadd [#allocation4], 4294967168 }
0x2d7f   :  { %2404 = vsyncpa [#allocation3], 1 }
0x2d80   :  { %2405 = vsyncpa [#allocation4], 1 }

</bundles_post_ra>
